<compile_context>
chip_gen: v5e
topology: v5e:2x2
jax: 0.10.0
libtpu: 0.0.40
codegen_flags: <defaults>
</compile_context>

<pallas_src>
import jax
import jax.numpy as jnp
from jax.experimental import pallas as pl
from jax.experimental.pallas import tpu as pltpu


def dual_lstm_score_kernel(x_ref, wih_ref, whh_ref, b_ref, m_ref, out_ref,
                           pgi_ref, pgf_ref, pgg_ref, pgo_ref):
    """Fused DualEncoder forward.

    x_ref   : (T, BP, E)  time-major embedded tokens; rows [0:B]=context, [B:2B]=response,
                          rows [2B:BP] are zero padding (ignored).
    wih_ref : (E, 4H)     input->gates weights, gate order (i, f, g, o) along 4H.
    whh_ref : (4, H, H)   per-gate recurrent weights (i, f, g, o).
    b_ref   : (1, 4H)     b_ih + b_hh, same gate order.
    m_ref   : (H, H)      bilinear score matrix M.
    out_ref : (1, B)      lane-dense scores; score[b] = (h_ctx[b] @ M) . h_resp[b].
    pg*_ref : (T, BP, H)  VMEM scratch holding the per-gate hoisted input projections.
    """
    T, BP, E = x_ref.shape
    H = m_ref.shape[0]
    B = out_ref.shape[1]
    f32 = jnp.float32

    # ---- prologue: hoisted input projection (one big MXU matmul), bias added once ----
    x2d = x_ref[...].reshape(T * BP, E)
    pre = jnp.dot(x2d, wih_ref[...], preferred_element_type=f32) + b_ref[...]   # (T*BP, 4H)
    # Split into per-gate, time-major slabs ONCE (outside the serial loop).
    pgi_ref[...] = pre[:, 0 * H:1 * H].reshape(T, BP, H)
    pgf_ref[...] = pre[:, 1 * H:2 * H].reshape(T, BP, H)
    pgg_ref[...] = pre[:, 2 * H:3 * H].reshape(T, BP, H)
    pgo_ref[...] = pre[:, 3 * H:4 * H].reshape(T, BP, H)

    w_i = whh_ref[0]   # (H, H)
    w_f = whh_ref[1]
    w_g = whh_ref[2]
    w_o = whh_ref[3]

    # ---- recurrence: only `h @ W_hh_gate + pregate[t]` + elementwise per step ----
    def step(t, carry):
        h, c = carry
        i_g = jax.nn.sigmoid(pgi_ref[t] + jnp.dot(h, w_i, preferred_element_type=f32))
        f_g = jax.nn.sigmoid(pgf_ref[t] + jnp.dot(h, w_f, preferred_element_type=f32))
        g_g = jnp.tanh(pgg_ref[t] + jnp.dot(h, w_g, preferred_element_type=f32))
        o_g = jax.nn.sigmoid(pgo_ref[t] + jnp.dot(h, w_o, preferred_element_type=f32))
        c_new = f_g * c + i_g * g_g
        h_new = o_g * jnp.tanh(c_new)
        return (h_new, c_new)

    h0 = jnp.zeros((BP, H), f32)
    c0 = jnp.zeros((BP, H), f32)
    h_last, _ = jax.lax.fori_loop(0, T, step, (h0, c0), unroll=True)

    # ---- epilogue: fused bilinear score, lane-dense (1, B) output ----
    h_ctx = h_last[0:B]            # (B, H)
    h_resp = h_last[B:2 * B]       # (B, H)
    cm = jnp.dot(h_ctx, m_ref[...], preferred_element_type=f32)              # (B, H)
    # big[i, j] = cm[i] . h_resp[j]; the diagonal holds the scores.  Extracting it via a
    # sublane reduction keeps the result lane-dense as a (1, B) row.
    big = jnp.einsum('bh,ch->bc', cm, h_resp, preferred_element_type=f32)    # (B, B)
    rr = jax.lax.broadcasted_iota(jnp.int32, (B, B), 0)
    cc = jax.lax.broadcasted_iota(jnp.int32, (B, B), 1)
    out_ref[...] = jnp.sum(jnp.where(rr == cc, big, 0.0), axis=0, keepdims=True)


def fused_dual_encoder_call(x_tbe, w_ih, w_hh, b, M, B):
    """Single pallas_call wrapping both encodes + the bilinear score."""
    T, BP, E = x_tbe.shape
    H = M.shape[0]
    return pl.pallas_call(
        dual_lstm_score_kernel,
        out_shape=jax.ShapeDtypeStruct((1, B), jnp.float32),
        grid=(1,),
        in_specs=[
            pl.BlockSpec((T, BP, E), lambda i: (0, 0, 0)),
            pl.BlockSpec((E, 4 * H), lambda i: (0, 0)),
            pl.BlockSpec((4, H, H), lambda i: (0, 0, 0)),
            pl.BlockSpec((1, 4 * H), lambda i: (0, 0)),
            pl.BlockSpec((H, H), lambda i: (0, 0)),
        ],
        out_specs=pl.BlockSpec((1, B), lambda i: (0, 0)),
        scratch_shapes=[pltpu.VMEM((T, BP, H), jnp.float32)] * 4,
        compiler_params=pltpu.CompilerParams(
            dimension_semantics=("arbitrary",)),
    )(x_tbe, w_ih, w_hh, b, M)


def dual_encoder_forward(params, context_ids, response_ids):
    """Full DualEncoder.forward: encode both sides with the SAME encoder, bilinear score."""
    emb = params["embedding"]                      # (V, E)
    B, T = context_ids.shape
    E = emb.shape[1]

    # Time-major gather: transpose the tiny (B, T) id matrices, not the (B, T, E) tensor.
    ids_tb = jnp.concatenate([context_ids.T, response_ids.T], axis=1)     # (T, 2B)
    x_tbe = emb[ids_tb].astype(jnp.float32)                               # (T, 2B, E)

    # Pad the fused batch up to the 8-sublane granularity; padded rows are ignored.
    BP = max(8, ((2 * B + 7) // 8) * 8)
    if BP > 2 * B:
        x_tbe = jnp.concatenate(
            [x_tbe, jnp.zeros((T, BP - 2 * B, E), jnp.float32)], axis=1)

    scores_1b = fused_dual_encoder_call(
        x_tbe, params["w_ih"], params["w_hh"], params["b"], params["M"], B)   # (1, B)
    return scores_1b.reshape(B, 1)                                            # torch view (B, 1)


# ------------------------- pure-JAX reference (for sanity check) -------------------------
def dual_encoder_reference(params, context_ids, response_ids):
    emb = params["embedding"]
    w_ih, b, M = params["w_ih"], params["b"], params["M"]
    H = M.shape[0]
    # Rebuild the flat (H, 4H) recurrent weight from the per-gate (4, H, H) layout.
    w_hh = jnp.transpose(params["w_hh"], (1, 0, 2)).reshape(H, 4 * H)

    def encode(ids):
        x = emb[ids].astype(jnp.float32)           # (B, T, E)
        Bx, T, _ = x.shape
        h = jnp.zeros((Bx, H), jnp.float32)
        c = jnp.zeros((Bx, H), jnp.float32)
        for t in range(T):
            gates = x[:, t, :] @ w_ih + h @ w_hh + b
            i_g = jax.nn.sigmoid(gates[:, 0:H])
            f_g = jax.nn.sigmoid(gates[:, H:2 * H])
            g_g = jnp.tanh(gates[:, 2 * H:3 * H])
            o_g = jax.nn.sigmoid(gates[:, 3 * H:4 * H])
            c = f_g * c + i_g * g_g
            h = o_g * jnp.tanh(c)
        return h

    hc, hr = encode(context_ids), encode(response_ids)
    return jnp.sum((hc @ M) * hr, axis=-1, keepdims=True)


# ------------------------------------ setup / main ------------------------------------
def init_params(key, vocab_size, emb_size, hidden_size):
    k_emb, k_ih, k_hh, k_bih, k_bhh, k_m = jax.random.split(key, 6)
    H = hidden_size
    bound = 1.0 / jnp.sqrt(H)                      # PyTorch LSTM default init
    params = {
        "embedding": jax.random.normal(k_emb, (vocab_size, emb_size), jnp.float32),
        # input->gates weights pre-transposed vs torch: (E, 4H), gate order (i, f, g, o)
        "w_ih": jax.random.uniform(k_ih, (emb_size, 4 * H), jnp.float32, -bound, bound),
        # recurrent weights stored per-gate: (4, H, H)
        "w_hh": jax.random.uniform(k_hh, (4, H, H), jnp.float32, -bound, bound),
        "b": (jax.random.uniform(k_bih, (1, 4 * H), jnp.float32, -bound, bound)
              + jax.random.uniform(k_bhh, (1, 4 * H), jnp.float32, -bound, bound)),
        # xavier_normal for M: std = sqrt(2 / (H + H))
        "M": jax.random.normal(k_m, (H, H), jnp.float32) * jnp.sqrt(2.0 / (2 * H)),
    }
    return params


if __name__ == "__main__":
    B, T, V, E, H = 2, 8, 32, 16, 32

    key = jax.random.PRNGKey(0)
    k_params, k_ctx, k_resp = jax.random.split(key, 3)
    params = init_params(k_params, V, E, H)

    context_ids = jax.random.randint(k_ctx, (B, T), 0, V, dtype=jnp.int32)
    response_ids = jax.random.randint(k_resp, (B, T), 0, V, dtype=jnp.int32)

    score = dual_encoder_forward(params, context_ids, response_ids)
    score = jax.block_until_ready(score)

    ref = dual_encoder_reference(params, context_ids, response_ids)
    assert score.shape == (B, 1)
    assert jnp.allclose(score, ref, atol=1e-4, rtol=1e-4), (score, ref)

    print("KERNEL_OK")
</pallas_src>

<mosaic_0001>
module attributes {stable_mosaic.version = 11 : i64} {
  func.func @dual_lstm_score_kernel(%arg0: i32, %arg1: memref<8x8x16xf32, #tpu.memory_space<vmem>>, %arg2: memref<16x128xf32, #tpu.memory_space<vmem>>, %arg3: memref<4x32x32xf32, #tpu.memory_space<vmem>>, %arg4: memref<1x128xf32, #tpu.memory_space<vmem>>, %arg5: memref<32x32xf32, #tpu.memory_space<vmem>>, %arg6: memref<1x2xf32, #tpu.memory_space<vmem>>, %arg7: memref<8x8x32xf32, #tpu.memory_space<vmem>>, %arg8: memref<8x8x32xf32, #tpu.memory_space<vmem>>, %arg9: memref<8x8x32xf32, #tpu.memory_space<vmem>>, %arg10: memref<8x8x32xf32, #tpu.memory_space<vmem>>) attributes {dimension_semantics = [#tpu.dimension_semantics<arbitrary>], iteration_bounds = array<i64: 1>, scalar_prefetch = 0 : i64, scratch_operands = 4 : i64, tpu.core_type = #tpu.core_type<tc>, window_params = [{pipeline_mode = #tpu.pipeline_mode<synchronous>, transform_indices = @transform_0, window_bounds = array<i64: 8, 8, 16>}, {pipeline_mode = #tpu.pipeline_mode<synchronous>, transform_indices = @transform_1, window_bounds = array<i64: 16, 128>}, {pipeline_mode = #tpu.pipeline_mode<synchronous>, transform_indices = @transform_2, window_bounds = array<i64: 4, 32, 32>}, {pipeline_mode = #tpu.pipeline_mode<synchronous>, transform_indices = @transform_3, window_bounds = array<i64: 1, 128>}, {pipeline_mode = #tpu.pipeline_mode<synchronous>, transform_indices = @transform_4, window_bounds = array<i64: 32, 32>}, {pipeline_mode = #tpu.pipeline_mode<synchronous>, transform_indices = @transform_5, window_bounds = array<i64: 1, 2>}]} {
    %c0 = arith.constant 0 : index
    %c0_0 = arith.constant 0 : index
    %c0_1 = arith.constant 0 : index
    %0 = vector.load %arg1[%c0, %c0_0, %c0_1] : memref<8x8x16xf32, #tpu.memory_space<vmem>>, vector<8x8x16xf32>
    %1 = vector.shape_cast %0 : vector<8x8x16xf32> to vector<64x16xf32>
    %c0_2 = arith.constant 0 : index
    %c0_3 = arith.constant 0 : index
    %2 = vector.load %arg2[%c0_2, %c0_3] : memref<16x128xf32, #tpu.memory_space<vmem>>, vector<16x128xf32>
    %cst = arith.constant dense<0.000000e+00> : vector<64x128xf32>
    %3 = tpu.matmul %1, %2, %cst {dimension_numbers = #tpu.dot_dimension_numbers<[1], [0], [0], [1], [0, 0, 1, 1], [], []>} : vector<64x16xf32>, vector<16x128xf32>, vector<64x128xf32> -> vector<64x128xf32>
    %c0_4 = arith.constant 0 : index
    %c0_5 = arith.constant 0 : index
    %4 = vector.load %arg4[%c0_4, %c0_5] : memref<1x128xf32, #tpu.memory_space<vmem>>, vector<1x128xf32>
    %5 = vector.broadcast %4 : vector<1x128xf32> to vector<64x128xf32>
    %6 = arith.addf %3, %5 : vector<64x128xf32>
    %7 = vector.extract_strided_slice %6 {offsets = [0, 0], sizes = [64, 32], strides = [1, 1]} : vector<64x128xf32> to vector<64x32xf32>
    %8 = vector.shape_cast %7 : vector<64x32xf32> to vector<8x8x32xf32>
    %c0_6 = arith.constant 0 : index
    %c0_7 = arith.constant 0 : index
    %c0_8 = arith.constant 0 : index
    %9 = vector.load %arg7[%c0_6, %c0_7, %c0_8] : memref<8x8x32xf32, #tpu.memory_space<vmem>>, vector<8x8x32xf32>
    tpu.vector_store %arg7[%c0_6, %c0_7, %c0_8], %8 {strides = array<i32>} : memref<8x8x32xf32, #tpu.memory_space<vmem>>, vector<8x8x32xf32>,
    %10 = vector.extract_strided_slice %6 {offsets = [0, 32], sizes = [64, 32], strides = [1, 1]} : vector<64x128xf32> to vector<64x32xf32>
    %11 = vector.shape_cast %10 : vector<64x32xf32> to vector<8x8x32xf32>
    %c0_9 = arith.constant 0 : index
    %c0_10 = arith.constant 0 : index
    %c0_11 = arith.constant 0 : index
    %12 = vector.load %arg8[%c0_9, %c0_10, %c0_11] : memref<8x8x32xf32, #tpu.memory_space<vmem>>, vector<8x8x32xf32>
    tpu.vector_store %arg8[%c0_9, %c0_10, %c0_11], %11 {strides = array<i32>} : memref<8x8x32xf32, #tpu.memory_space<vmem>>, vector<8x8x32xf32>,
    %13 = vector.extract_strided_slice %6 {offsets = [0, 64], sizes = [64, 32], strides = [1, 1]} : vector<64x128xf32> to vector<64x32xf32>
    %14 = vector.shape_cast %13 : vector<64x32xf32> to vector<8x8x32xf32>
    %c0_12 = arith.constant 0 : index
    %c0_13 = arith.constant 0 : index
    %c0_14 = arith.constant 0 : index
    %15 = vector.load %arg9[%c0_12, %c0_13, %c0_14] : memref<8x8x32xf32, #tpu.memory_space<vmem>>, vector<8x8x32xf32>
    tpu.vector_store %arg9[%c0_12, %c0_13, %c0_14], %14 {strides = array<i32>} : memref<8x8x32xf32, #tpu.memory_space<vmem>>, vector<8x8x32xf32>,
    %16 = vector.extract_strided_slice %6 {offsets = [0, 96], sizes = [64, 32], strides = [1, 1]} : vector<64x128xf32> to vector<64x32xf32>
    %17 = vector.shape_cast %16 : vector<64x32xf32> to vector<8x8x32xf32>
    %c0_15 = arith.constant 0 : index
    %c0_16 = arith.constant 0 : index
    %c0_17 = arith.constant 0 : index
    %18 = vector.load %arg10[%c0_15, %c0_16, %c0_17] : memref<8x8x32xf32, #tpu.memory_space<vmem>>, vector<8x8x32xf32>
    tpu.vector_store %arg10[%c0_15, %c0_16, %c0_17], %17 {strides = array<i32>} : memref<8x8x32xf32, #tpu.memory_space<vmem>>, vector<8x8x32xf32>,
    %c0_18 = arith.constant 0 : index
    %c0_19 = arith.constant 0 : index
    %c0_20 = arith.constant 0 : index
    %19 = vector.load %arg3[%c0_18, %c0_19, %c0_20] : memref<4x32x32xf32, #tpu.memory_space<vmem>>, vector<1x32x32xf32>
    %20 = vector.shape_cast %19 : vector<1x32x32xf32> to vector<32x32xf32>
    %c1 = arith.constant 1 : index
    %c0_21 = arith.constant 0 : index
    %c0_22 = arith.constant 0 : index
    %21 = vector.load %arg3[%c1, %c0_21, %c0_22] : memref<4x32x32xf32, #tpu.memory_space<vmem>>, vector<1x32x32xf32>
    %22 = vector.shape_cast %21 : vector<1x32x32xf32> to vector<32x32xf32>
    %c2 = arith.constant 2 : index
    %c0_23 = arith.constant 0 : index
    %c0_24 = arith.constant 0 : index
    %23 = vector.load %arg3[%c2, %c0_23, %c0_24] : memref<4x32x32xf32, #tpu.memory_space<vmem>>, vector<1x32x32xf32>
    %24 = vector.shape_cast %23 : vector<1x32x32xf32> to vector<32x32xf32>
    %c3 = arith.constant 3 : index
    %c0_25 = arith.constant 0 : index
    %c0_26 = arith.constant 0 : index
    %25 = vector.load %arg3[%c3, %c0_25, %c0_26] : memref<4x32x32xf32, #tpu.memory_space<vmem>>, vector<1x32x32xf32>
    %26 = vector.shape_cast %25 : vector<1x32x32xf32> to vector<32x32xf32>
    %cst_27 = arith.constant 0.000000e+00 : f32
    %27 = vector.broadcast %cst_27 : f32 to vector<8x32xf32>
    %cst_28 = arith.constant 0.000000e+00 : f32
    %28 = vector.broadcast %cst_28 : f32 to vector<8x32xf32>
    %c0_i32 = arith.constant 0 : i32
    %29 = arith.index_cast %c0_i32 : i32 to index
    %c0_29 = arith.constant 0 : index
    %c0_30 = arith.constant 0 : index
    %30 = vector.load %arg7[%29, %c0_29, %c0_30] : memref<8x8x32xf32, #tpu.memory_space<vmem>>, vector<1x8x32xf32>
    %31 = vector.shape_cast %30 : vector<1x8x32xf32> to vector<8x32xf32>
    %cst_31 = arith.constant dense<0.000000e+00> : vector<8x32xf32>
    %32 = tpu.matmul %27, %20, %cst_31 {dimension_numbers = #tpu.dot_dimension_numbers<[1], [0], [0], [1], [0, 0, 1, 1], [], []>} : vector<8x32xf32>, vector<32x32xf32>, vector<8x32xf32> -> vector<8x32xf32>
    %33 = arith.addf %31, %32 : vector<8x32xf32>
    %34 = arith.negf %33 : vector<8x32xf32>
    %35 = math.exp %34 : vector<8x32xf32>
    %cst_32 = arith.constant 1.000000e+00 : f32
    %36 = vector.broadcast %cst_32 : f32 to vector<8x32xf32>
    %37 = arith.addf %36, %35 : vector<8x32xf32>
    %38 = arith.divf %36, %37 : vector<8x32xf32>
    %39 = arith.index_cast %c0_i32 : i32 to index
    %c0_33 = arith.constant 0 : index
    %c0_34 = arith.constant 0 : index
    %40 = vector.load %arg8[%39, %c0_33, %c0_34] : memref<8x8x32xf32, #tpu.memory_space<vmem>>, vector<1x8x32xf32>
    %41 = vector.shape_cast %40 : vector<1x8x32xf32> to vector<8x32xf32>
    %cst_35 = arith.constant dense<0.000000e+00> : vector<8x32xf32>
    %42 = tpu.matmul %27, %22, %cst_35 {dimension_numbers = #tpu.dot_dimension_numbers<[1], [0], [0], [1], [0, 0, 1, 1], [], []>} : vector<8x32xf32>, vector<32x32xf32>, vector<8x32xf32> -> vector<8x32xf32>
    %43 = arith.addf %41, %42 : vector<8x32xf32>
    %44 = arith.negf %43 : vector<8x32xf32>
    %45 = math.exp %44 : vector<8x32xf32>
    %cst_36 = arith.constant 1.000000e+00 : f32
    %46 = vector.broadcast %cst_36 : f32 to vector<8x32xf32>
    %47 = arith.addf %46, %45 : vector<8x32xf32>
    %48 = arith.divf %46, %47 : vector<8x32xf32>
    %49 = arith.index_cast %c0_i32 : i32 to index
    %c0_37 = arith.constant 0 : index
    %c0_38 = arith.constant 0 : index
    %50 = vector.load %arg9[%49, %c0_37, %c0_38] : memref<8x8x32xf32, #tpu.memory_space<vmem>>, vector<1x8x32xf32>
    %51 = vector.shape_cast %50 : vector<1x8x32xf32> to vector<8x32xf32>
    %cst_39 = arith.constant dense<0.000000e+00> : vector<8x32xf32>
    %52 = tpu.matmul %27, %24, %cst_39 {dimension_numbers = #tpu.dot_dimension_numbers<[1], [0], [0], [1], [0, 0, 1, 1], [], []>} : vector<8x32xf32>, vector<32x32xf32>, vector<8x32xf32> -> vector<8x32xf32>
    %53 = arith.addf %51, %52 : vector<8x32xf32>
    %54 = math.tanh %53 : vector<8x32xf32>
    %55 = arith.index_cast %c0_i32 : i32 to index
    %c0_40 = arith.constant 0 : index
    %c0_41 = arith.constant 0 : index
    %56 = vector.load %arg10[%55, %c0_40, %c0_41] : memref<8x8x32xf32, #tpu.memory_space<vmem>>, vector<1x8x32xf32>
    %57 = vector.shape_cast %56 : vector<1x8x32xf32> to vector<8x32xf32>
    %cst_42 = arith.constant dense<0.000000e+00> : vector<8x32xf32>
    %58 = tpu.matmul %27, %26, %cst_42 {dimension_numbers = #tpu.dot_dimension_numbers<[1], [0], [0], [1], [0, 0, 1, 1], [], []>} : vector<8x32xf32>, vector<32x32xf32>, vector<8x32xf32> -> vector<8x32xf32>
    %59 = arith.addf %57, %58 : vector<8x32xf32>
    %60 = arith.negf %59 : vector<8x32xf32>
    %61 = math.exp %60 : vector<8x32xf32>
    %cst_43 = arith.constant 1.000000e+00 : f32
    %62 = vector.broadcast %cst_43 : f32 to vector<8x32xf32>
    %63 = arith.addf %62, %61 : vector<8x32xf32>
    %64 = arith.divf %62, %63 : vector<8x32xf32>
    %65 = arith.mulf %48, %28 : vector<8x32xf32>
    %66 = arith.mulf %38, %54 : vector<8x32xf32>
    %67 = arith.addf %65, %66 : vector<8x32xf32>
    %68 = math.tanh %67 : vector<8x32xf32>
    %69 = arith.mulf %64, %68 : vector<8x32xf32>
    %c1_i32 = arith.constant 1 : i32
    %70 = arith.index_cast %c1_i32 : i32 to index
    %c0_44 = arith.constant 0 : index
    %c0_45 = arith.constant 0 : index
    %71 = vector.load %arg7[%70, %c0_44, %c0_45] : memref<8x8x32xf32, #tpu.memory_space<vmem>>, vector<1x8x32xf32>
    %72 = vector.shape_cast %71 : vector<1x8x32xf32> to vector<8x32xf32>
    %cst_46 = arith.constant dense<0.000000e+00> : vector<8x32xf32>
    %73 = tpu.matmul %69, %20, %cst_46 {dimension_numbers = #tpu.dot_dimension_numbers<[1], [0], [0], [1], [0, 0, 1, 1], [], []>} : vector<8x32xf32>, vector<32x32xf32>, vector<8x32xf32> -> vector<8x32xf32>
    %74 = arith.addf %72, %73 : vector<8x32xf32>
    %75 = arith.negf %74 : vector<8x32xf32>
    %76 = math.exp %75 : vector<8x32xf32>
    %cst_47 = arith.constant 1.000000e+00 : f32
    %77 = vector.broadcast %cst_47 : f32 to vector<8x32xf32>
    %78 = arith.addf %77, %76 : vector<8x32xf32>
    %79 = arith.divf %77, %78 : vector<8x32xf32>
    %80 = arith.index_cast %c1_i32 : i32 to index
    %c0_48 = arith.constant 0 : index
    %c0_49 = arith.constant 0 : index
    %81 = vector.load %arg8[%80, %c0_48, %c0_49] : memref<8x8x32xf32, #tpu.memory_space<vmem>>, vector<1x8x32xf32>
    %82 = vector.shape_cast %81 : vector<1x8x32xf32> to vector<8x32xf32>
    %cst_50 = arith.constant dense<0.000000e+00> : vector<8x32xf32>
    %83 = tpu.matmul %69, %22, %cst_50 {dimension_numbers = #tpu.dot_dimension_numbers<[1], [0], [0], [1], [0, 0, 1, 1], [], []>} : vector<8x32xf32>, vector<32x32xf32>, vector<8x32xf32> -> vector<8x32xf32>
    %84 = arith.addf %82, %83 : vector<8x32xf32>
    %85 = arith.negf %84 : vector<8x32xf32>
    %86 = math.exp %85 : vector<8x32xf32>
    %cst_51 = arith.constant 1.000000e+00 : f32
    %87 = vector.broadcast %cst_51 : f32 to vector<8x32xf32>
    %88 = arith.addf %87, %86 : vector<8x32xf32>
    %89 = arith.divf %87, %88 : vector<8x32xf32>
    %90 = arith.index_cast %c1_i32 : i32 to index
    %c0_52 = arith.constant 0 : index
    %c0_53 = arith.constant 0 : index
    %91 = vector.load %arg9[%90, %c0_52, %c0_53] : memref<8x8x32xf32, #tpu.memory_space<vmem>>, vector<1x8x32xf32>
    %92 = vector.shape_cast %91 : vector<1x8x32xf32> to vector<8x32xf32>
    %cst_54 = arith.constant dense<0.000000e+00> : vector<8x32xf32>
    %93 = tpu.matmul %69, %24, %cst_54 {dimension_numbers = #tpu.dot_dimension_numbers<[1], [0], [0], [1], [0, 0, 1, 1], [], []>} : vector<8x32xf32>, vector<32x32xf32>, vector<8x32xf32> -> vector<8x32xf32>
    %94 = arith.addf %92, %93 : vector<8x32xf32>
    %95 = math.tanh %94 : vector<8x32xf32>
    %96 = arith.index_cast %c1_i32 : i32 to index
    %c0_55 = arith.constant 0 : index
    %c0_56 = arith.constant 0 : index
    %97 = vector.load %arg10[%96, %c0_55, %c0_56] : memref<8x8x32xf32, #tpu.memory_space<vmem>>, vector<1x8x32xf32>
    %98 = vector.shape_cast %97 : vector<1x8x32xf32> to vector<8x32xf32>
    %cst_57 = arith.constant dense<0.000000e+00> : vector<8x32xf32>
    %99 = tpu.matmul %69, %26, %cst_57 {dimension_numbers = #tpu.dot_dimension_numbers<[1], [0], [0], [1], [0, 0, 1, 1], [], []>} : vector<8x32xf32>, vector<32x32xf32>, vector<8x32xf32> -> vector<8x32xf32>
    %100 = arith.addf %98, %99 : vector<8x32xf32>
    %101 = arith.negf %100 : vector<8x32xf32>
    %102 = math.exp %101 : vector<8x32xf32>
    %cst_58 = arith.constant 1.000000e+00 : f32
    %103 = vector.broadcast %cst_58 : f32 to vector<8x32xf32>
    %104 = arith.addf %103, %102 : vector<8x32xf32>
    %105 = arith.divf %103, %104 : vector<8x32xf32>
    %106 = arith.mulf %89, %67 : vector<8x32xf32>
    %107 = arith.mulf %79, %95 : vector<8x32xf32>
    %108 = arith.addf %106, %107 : vector<8x32xf32>
    %109 = math.tanh %108 : vector<8x32xf32>
    %110 = arith.mulf %105, %109 : vector<8x32xf32>
    %c2_i32 = arith.constant 2 : i32
    %111 = arith.index_cast %c2_i32 : i32 to index
    %c0_59 = arith.constant 0 : index
    %c0_60 = arith.constant 0 : index
    %112 = vector.load %arg7[%111, %c0_59, %c0_60] : memref<8x8x32xf32, #tpu.memory_space<vmem>>, vector<1x8x32xf32>
    %113 = vector.shape_cast %112 : vector<1x8x32xf32> to vector<8x32xf32>
    %cst_61 = arith.constant dense<0.000000e+00> : vector<8x32xf32>
    %114 = tpu.matmul %110, %20, %cst_61 {dimension_numbers = #tpu.dot_dimension_numbers<[1], [0], [0], [1], [0, 0, 1, 1], [], []>} : vector<8x32xf32>, vector<32x32xf32>, vector<8x32xf32> -> vector<8x32xf32>
    %115 = arith.addf %113, %114 : vector<8x32xf32>
    %116 = arith.negf %115 : vector<8x32xf32>
    %117 = math.exp %116 : vector<8x32xf32>
    %cst_62 = arith.constant 1.000000e+00 : f32
    %118 = vector.broadcast %cst_62 : f32 to vector<8x32xf32>
    %119 = arith.addf %118, %117 : vector<8x32xf32>
    %120 = arith.divf %118, %119 : vector<8x32xf32>
    %121 = arith.index_cast %c2_i32 : i32 to index
    %c0_63 = arith.constant 0 : index
    %c0_64 = arith.constant 0 : index
    %122 = vector.load %arg8[%121, %c0_63, %c0_64] : memref<8x8x32xf32, #tpu.memory_space<vmem>>, vector<1x8x32xf32>
    %123 = vector.shape_cast %122 : vector<1x8x32xf32> to vector<8x32xf32>
    %cst_65 = arith.constant dense<0.000000e+00> : vector<8x32xf32>
    %124 = tpu.matmul %110, %22, %cst_65 {dimension_numbers = #tpu.dot_dimension_numbers<[1], [0], [0], [1], [0, 0, 1, 1], [], []>} : vector<8x32xf32>, vector<32x32xf32>, vector<8x32xf32> -> vector<8x32xf32>
    %125 = arith.addf %123, %124 : vector<8x32xf32>
    %126 = arith.negf %125 : vector<8x32xf32>
    %127 = math.exp %126 : vector<8x32xf32>
    %cst_66 = arith.constant 1.000000e+00 : f32
    %128 = vector.broadcast %cst_66 : f32 to vector<8x32xf32>
    %129 = arith.addf %128, %127 : vector<8x32xf32>
    %130 = arith.divf %128, %129 : vector<8x32xf32>
    %131 = arith.index_cast %c2_i32 : i32 to index
    %c0_67 = arith.constant 0 : index
    %c0_68 = arith.constant 0 : index
    %132 = vector.load %arg9[%131, %c0_67, %c0_68] : memref<8x8x32xf32, #tpu.memory_space<vmem>>, vector<1x8x32xf32>
    %133 = vector.shape_cast %132 : vector<1x8x32xf32> to vector<8x32xf32>
    %cst_69 = arith.constant dense<0.000000e+00> : vector<8x32xf32>
    %134 = tpu.matmul %110, %24, %cst_69 {dimension_numbers = #tpu.dot_dimension_numbers<[1], [0], [0], [1], [0, 0, 1, 1], [], []>} : vector<8x32xf32>, vector<32x32xf32>, vector<8x32xf32> -> vector<8x32xf32>
    %135 = arith.addf %133, %134 : vector<8x32xf32>
    %136 = math.tanh %135 : vector<8x32xf32>
    %137 = arith.index_cast %c2_i32 : i32 to index
    %c0_70 = arith.constant 0 : index
    %c0_71 = arith.constant 0 : index
    %138 = vector.load %arg10[%137, %c0_70, %c0_71] : memref<8x8x32xf32, #tpu.memory_space<vmem>>, vector<1x8x32xf32>
    %139 = vector.shape_cast %138 : vector<1x8x32xf32> to vector<8x32xf32>
    %cst_72 = arith.constant dense<0.000000e+00> : vector<8x32xf32>
    %140 = tpu.matmul %110, %26, %cst_72 {dimension_numbers = #tpu.dot_dimension_numbers<[1], [0], [0], [1], [0, 0, 1, 1], [], []>} : vector<8x32xf32>, vector<32x32xf32>, vector<8x32xf32> -> vector<8x32xf32>
    %141 = arith.addf %139, %140 : vector<8x32xf32>
    %142 = arith.negf %141 : vector<8x32xf32>
    %143 = math.exp %142 : vector<8x32xf32>
    %cst_73 = arith.constant 1.000000e+00 : f32
    %144 = vector.broadcast %cst_73 : f32 to vector<8x32xf32>
    %145 = arith.addf %144, %143 : vector<8x32xf32>
    %146 = arith.divf %144, %145 : vector<8x32xf32>
    %147 = arith.mulf %130, %108 : vector<8x32xf32>
    %148 = arith.mulf %120, %136 : vector<8x32xf32>
    %149 = arith.addf %147, %148 : vector<8x32xf32>
    %150 = math.tanh %149 : vector<8x32xf32>
    %151 = arith.mulf %146, %150 : vector<8x32xf32>
    %c3_i32 = arith.constant 3 : i32
    %152 = arith.index_cast %c3_i32 : i32 to index
    %c0_74 = arith.constant 0 : index
    %c0_75 = arith.constant 0 : index
    %153 = vector.load %arg7[%152, %c0_74, %c0_75] : memref<8x8x32xf32, #tpu.memory_space<vmem>>, vector<1x8x32xf32>
    %154 = vector.shape_cast %153 : vector<1x8x32xf32> to vector<8x32xf32>
    %cst_76 = arith.constant dense<0.000000e+00> : vector<8x32xf32>
    %155 = tpu.matmul %151, %20, %cst_76 {dimension_numbers = #tpu.dot_dimension_numbers<[1], [0], [0], [1], [0, 0, 1, 1], [], []>} : vector<8x32xf32>, vector<32x32xf32>, vector<8x32xf32> -> vector<8x32xf32>
    %156 = arith.addf %154, %155 : vector<8x32xf32>
    %157 = arith.negf %156 : vector<8x32xf32>
    %158 = math.exp %157 : vector<8x32xf32>
    %cst_77 = arith.constant 1.000000e+00 : f32
    %159 = vector.broadcast %cst_77 : f32 to vector<8x32xf32>
    %160 = arith.addf %159, %158 : vector<8x32xf32>
    %161 = arith.divf %159, %160 : vector<8x32xf32>
    %162 = arith.index_cast %c3_i32 : i32 to index
    %c0_78 = arith.constant 0 : index
    %c0_79 = arith.constant 0 : index
    %163 = vector.load %arg8[%162, %c0_78, %c0_79] : memref<8x8x32xf32, #tpu.memory_space<vmem>>, vector<1x8x32xf32>
    %164 = vector.shape_cast %163 : vector<1x8x32xf32> to vector<8x32xf32>
    %cst_80 = arith.constant dense<0.000000e+00> : vector<8x32xf32>
    %165 = tpu.matmul %151, %22, %cst_80 {dimension_numbers = #tpu.dot_dimension_numbers<[1], [0], [0], [1], [0, 0, 1, 1], [], []>} : vector<8x32xf32>, vector<32x32xf32>, vector<8x32xf32> -> vector<8x32xf32>
    %166 = arith.addf %164, %165 : vector<8x32xf32>
    %167 = arith.negf %166 : vector<8x32xf32>
    %168 = math.exp %167 : vector<8x32xf32>
    %cst_81 = arith.constant 1.000000e+00 : f32
    %169 = vector.broadcast %cst_81 : f32 to vector<8x32xf32>
    %170 = arith.addf %169, %168 : vector<8x32xf32>
    %171 = arith.divf %169, %170 : vector<8x32xf32>
    %172 = arith.index_cast %c3_i32 : i32 to index
    %c0_82 = arith.constant 0 : index
    %c0_83 = arith.constant 0 : index
    %173 = vector.load %arg9[%172, %c0_82, %c0_83] : memref<8x8x32xf32, #tpu.memory_space<vmem>>, vector<1x8x32xf32>
    %174 = vector.shape_cast %173 : vector<1x8x32xf32> to vector<8x32xf32>
    %cst_84 = arith.constant dense<0.000000e+00> : vector<8x32xf32>
    %175 = tpu.matmul %151, %24, %cst_84 {dimension_numbers = #tpu.dot_dimension_numbers<[1], [0], [0], [1], [0, 0, 1, 1], [], []>} : vector<8x32xf32>, vector<32x32xf32>, vector<8x32xf32> -> vector<8x32xf32>
    %176 = arith.addf %174, %175 : vector<8x32xf32>
    %177 = math.tanh %176 : vector<8x32xf32>
    %178 = arith.index_cast %c3_i32 : i32 to index
    %c0_85 = arith.constant 0 : index
    %c0_86 = arith.constant 0 : index
    %179 = vector.load %arg10[%178, %c0_85, %c0_86] : memref<8x8x32xf32, #tpu.memory_space<vmem>>, vector<1x8x32xf32>
    %180 = vector.shape_cast %179 : vector<1x8x32xf32> to vector<8x32xf32>
    %cst_87 = arith.constant dense<0.000000e+00> : vector<8x32xf32>
    %181 = tpu.matmul %151, %26, %cst_87 {dimension_numbers = #tpu.dot_dimension_numbers<[1], [0], [0], [1], [0, 0, 1, 1], [], []>} : vector<8x32xf32>, vector<32x32xf32>, vector<8x32xf32> -> vector<8x32xf32>
    %182 = arith.addf %180, %181 : vector<8x32xf32>
    %183 = arith.negf %182 : vector<8x32xf32>
    %184 = math.exp %183 : vector<8x32xf32>
    %cst_88 = arith.constant 1.000000e+00 : f32
    %185 = vector.broadcast %cst_88 : f32 to vector<8x32xf32>
    %186 = arith.addf %185, %184 : vector<8x32xf32>
    %187 = arith.divf %185, %186 : vector<8x32xf32>
    %188 = arith.mulf %171, %149 : vector<8x32xf32>
    %189 = arith.mulf %161, %177 : vector<8x32xf32>
    %190 = arith.addf %188, %189 : vector<8x32xf32>
    %191 = math.tanh %190 : vector<8x32xf32>
    %192 = arith.mulf %187, %191 : vector<8x32xf32>
    %c4_i32 = arith.constant 4 : i32
    %193 = arith.index_cast %c4_i32 : i32 to index
    %c0_89 = arith.constant 0 : index
    %c0_90 = arith.constant 0 : index
    %194 = vector.load %arg7[%193, %c0_89, %c0_90] : memref<8x8x32xf32, #tpu.memory_space<vmem>>, vector<1x8x32xf32>
    %195 = vector.shape_cast %194 : vector<1x8x32xf32> to vector<8x32xf32>
    %cst_91 = arith.constant dense<0.000000e+00> : vector<8x32xf32>
    %196 = tpu.matmul %192, %20, %cst_91 {dimension_numbers = #tpu.dot_dimension_numbers<[1], [0], [0], [1], [0, 0, 1, 1], [], []>} : vector<8x32xf32>, vector<32x32xf32>, vector<8x32xf32> -> vector<8x32xf32>
    %197 = arith.addf %195, %196 : vector<8x32xf32>
    %198 = arith.negf %197 : vector<8x32xf32>
    %199 = math.exp %198 : vector<8x32xf32>
    %cst_92 = arith.constant 1.000000e+00 : f32
    %200 = vector.broadcast %cst_92 : f32 to vector<8x32xf32>
    %201 = arith.addf %200, %199 : vector<8x32xf32>
    %202 = arith.divf %200, %201 : vector<8x32xf32>
    %203 = arith.index_cast %c4_i32 : i32 to index
    %c0_93 = arith.constant 0 : index
    %c0_94 = arith.constant 0 : index
    %204 = vector.load %arg8[%203, %c0_93, %c0_94] : memref<8x8x32xf32, #tpu.memory_space<vmem>>, vector<1x8x32xf32>
    %205 = vector.shape_cast %204 : vector<1x8x32xf32> to vector<8x32xf32>
    %cst_95 = arith.constant dense<0.000000e+00> : vector<8x32xf32>
    %206 = tpu.matmul %192, %22, %cst_95 {dimension_numbers = #tpu.dot_dimension_numbers<[1], [0], [0], [1], [0, 0, 1, 1], [], []>} : vector<8x32xf32>, vector<32x32xf32>, vector<8x32xf32> -> vector<8x32xf32>
    %207 = arith.addf %205, %206 : vector<8x32xf32>
    %208 = arith.negf %207 : vector<8x32xf32>
    %209 = math.exp %208 : vector<8x32xf32>
    %cst_96 = arith.constant 1.000000e+00 : f32
    %210 = vector.broadcast %cst_96 : f32 to vector<8x32xf32>
    %211 = arith.addf %210, %209 : vector<8x32xf32>
    %212 = arith.divf %210, %211 : vector<8x32xf32>
    %213 = arith.index_cast %c4_i32 : i32 to index
    %c0_97 = arith.constant 0 : index
    %c0_98 = arith.constant 0 : index
    %214 = vector.load %arg9[%213, %c0_97, %c0_98] : memref<8x8x32xf32, #tpu.memory_space<vmem>>, vector<1x8x32xf32>
    %215 = vector.shape_cast %214 : vector<1x8x32xf32> to vector<8x32xf32>
    %cst_99 = arith.constant dense<0.000000e+00> : vector<8x32xf32>
    %216 = tpu.matmul %192, %24, %cst_99 {dimension_numbers = #tpu.dot_dimension_numbers<[1], [0], [0], [1], [0, 0, 1, 1], [], []>} : vector<8x32xf32>, vector<32x32xf32>, vector<8x32xf32> -> vector<8x32xf32>
    %217 = arith.addf %215, %216 : vector<8x32xf32>
    %218 = math.tanh %217 : vector<8x32xf32>
    %219 = arith.index_cast %c4_i32 : i32 to index
    %c0_100 = arith.constant 0 : index
    %c0_101 = arith.constant 0 : index
    %220 = vector.load %arg10[%219, %c0_100, %c0_101] : memref<8x8x32xf32, #tpu.memory_space<vmem>>, vector<1x8x32xf32>
    %221 = vector.shape_cast %220 : vector<1x8x32xf32> to vector<8x32xf32>
    %cst_102 = arith.constant dense<0.000000e+00> : vector<8x32xf32>
    %222 = tpu.matmul %192, %26, %cst_102 {dimension_numbers = #tpu.dot_dimension_numbers<[1], [0], [0], [1], [0, 0, 1, 1], [], []>} : vector<8x32xf32>, vector<32x32xf32>, vector<8x32xf32> -> vector<8x32xf32>
    %223 = arith.addf %221, %222 : vector<8x32xf32>
    %224 = arith.negf %223 : vector<8x32xf32>
    %225 = math.exp %224 : vector<8x32xf32>
    %cst_103 = arith.constant 1.000000e+00 : f32
    %226 = vector.broadcast %cst_103 : f32 to vector<8x32xf32>
    %227 = arith.addf %226, %225 : vector<8x32xf32>
    %228 = arith.divf %226, %227 : vector<8x32xf32>
    %229 = arith.mulf %212, %190 : vector<8x32xf32>
    %230 = arith.mulf %202, %218 : vector<8x32xf32>
    %231 = arith.addf %229, %230 : vector<8x32xf32>
    %232 = math.tanh %231 : vector<8x32xf32>
    %233 = arith.mulf %228, %232 : vector<8x32xf32>
    %c5_i32 = arith.constant 5 : i32
    %234 = arith.index_cast %c5_i32 : i32 to index
    %c0_104 = arith.constant 0 : index
    %c0_105 = arith.constant 0 : index
    %235 = vector.load %arg7[%234, %c0_104, %c0_105] : memref<8x8x32xf32, #tpu.memory_space<vmem>>, vector<1x8x32xf32>
    %236 = vector.shape_cast %235 : vector<1x8x32xf32> to vector<8x32xf32>
    %cst_106 = arith.constant dense<0.000000e+00> : vector<8x32xf32>
    %237 = tpu.matmul %233, %20, %cst_106 {dimension_numbers = #tpu.dot_dimension_numbers<[1], [0], [0], [1], [0, 0, 1, 1], [], []>} : vector<8x32xf32>, vector<32x32xf32>, vector<8x32xf32> -> vector<8x32xf32>
    %238 = arith.addf %236, %237 : vector<8x32xf32>
    %239 = arith.negf %238 : vector<8x32xf32>
    %240 = math.exp %239 : vector<8x32xf32>
    %cst_107 = arith.constant 1.000000e+00 : f32
    %241 = vector.broadcast %cst_107 : f32 to vector<8x32xf32>
    %242 = arith.addf %241, %240 : vector<8x32xf32>
    %243 = arith.divf %241, %242 : vector<8x32xf32>
    %244 = arith.index_cast %c5_i32 : i32 to index
    %c0_108 = arith.constant 0 : index
    %c0_109 = arith.constant 0 : index
    %245 = vector.load %arg8[%244, %c0_108, %c0_109] : memref<8x8x32xf32, #tpu.memory_space<vmem>>, vector<1x8x32xf32>
    %246 = vector.shape_cast %245 : vector<1x8x32xf32> to vector<8x32xf32>
    %cst_110 = arith.constant dense<0.000000e+00> : vector<8x32xf32>
    %247 = tpu.matmul %233, %22, %cst_110 {dimension_numbers = #tpu.dot_dimension_numbers<[1], [0], [0], [1], [0, 0, 1, 1], [], []>} : vector<8x32xf32>, vector<32x32xf32>, vector<8x32xf32> -> vector<8x32xf32>
    %248 = arith.addf %246, %247 : vector<8x32xf32>
    %249 = arith.negf %248 : vector<8x32xf32>
    %250 = math.exp %249 : vector<8x32xf32>
    %cst_111 = arith.constant 1.000000e+00 : f32
    %251 = vector.broadcast %cst_111 : f32 to vector<8x32xf32>
    %252 = arith.addf %251, %250 : vector<8x32xf32>
    %253 = arith.divf %251, %252 : vector<8x32xf32>
    %254 = arith.index_cast %c5_i32 : i32 to index
    %c0_112 = arith.constant 0 : index
    %c0_113 = arith.constant 0 : index
    %255 = vector.load %arg9[%254, %c0_112, %c0_113] : memref<8x8x32xf32, #tpu.memory_space<vmem>>, vector<1x8x32xf32>
    %256 = vector.shape_cast %255 : vector<1x8x32xf32> to vector<8x32xf32>
    %cst_114 = arith.constant dense<0.000000e+00> : vector<8x32xf32>
    %257 = tpu.matmul %233, %24, %cst_114 {dimension_numbers = #tpu.dot_dimension_numbers<[1], [0], [0], [1], [0, 0, 1, 1], [], []>} : vector<8x32xf32>, vector<32x32xf32>, vector<8x32xf32> -> vector<8x32xf32>
    %258 = arith.addf %256, %257 : vector<8x32xf32>
    %259 = math.tanh %258 : vector<8x32xf32>
    %260 = arith.index_cast %c5_i32 : i32 to index
    %c0_115 = arith.constant 0 : index
    %c0_116 = arith.constant 0 : index
    %261 = vector.load %arg10[%260, %c0_115, %c0_116] : memref<8x8x32xf32, #tpu.memory_space<vmem>>, vector<1x8x32xf32>
    %262 = vector.shape_cast %261 : vector<1x8x32xf32> to vector<8x32xf32>
    %cst_117 = arith.constant dense<0.000000e+00> : vector<8x32xf32>
    %263 = tpu.matmul %233, %26, %cst_117 {dimension_numbers = #tpu.dot_dimension_numbers<[1], [0], [0], [1], [0, 0, 1, 1], [], []>} : vector<8x32xf32>, vector<32x32xf32>, vector<8x32xf32> -> vector<8x32xf32>
    %264 = arith.addf %262, %263 : vector<8x32xf32>
    %265 = arith.negf %264 : vector<8x32xf32>
    %266 = math.exp %265 : vector<8x32xf32>
    %cst_118 = arith.constant 1.000000e+00 : f32
    %267 = vector.broadcast %cst_118 : f32 to vector<8x32xf32>
    %268 = arith.addf %267, %266 : vector<8x32xf32>
    %269 = arith.divf %267, %268 : vector<8x32xf32>
    %270 = arith.mulf %253, %231 : vector<8x32xf32>
    %271 = arith.mulf %243, %259 : vector<8x32xf32>
    %272 = arith.addf %270, %271 : vector<8x32xf32>
    %273 = math.tanh %272 : vector<8x32xf32>
    %274 = arith.mulf %269, %273 : vector<8x32xf32>
    %c6_i32 = arith.constant 6 : i32
    %275 = arith.index_cast %c6_i32 : i32 to index
    %c0_119 = arith.constant 0 : index
    %c0_120 = arith.constant 0 : index
    %276 = vector.load %arg7[%275, %c0_119, %c0_120] : memref<8x8x32xf32, #tpu.memory_space<vmem>>, vector<1x8x32xf32>
    %277 = vector.shape_cast %276 : vector<1x8x32xf32> to vector<8x32xf32>
    %cst_121 = arith.constant dense<0.000000e+00> : vector<8x32xf32>
    %278 = tpu.matmul %274, %20, %cst_121 {dimension_numbers = #tpu.dot_dimension_numbers<[1], [0], [0], [1], [0, 0, 1, 1], [], []>} : vector<8x32xf32>, vector<32x32xf32>, vector<8x32xf32> -> vector<8x32xf32>
    %279 = arith.addf %277, %278 : vector<8x32xf32>
    %280 = arith.negf %279 : vector<8x32xf32>
    %281 = math.exp %280 : vector<8x32xf32>
    %cst_122 = arith.constant 1.000000e+00 : f32
    %282 = vector.broadcast %cst_122 : f32 to vector<8x32xf32>
    %283 = arith.addf %282, %281 : vector<8x32xf32>
    %284 = arith.divf %282, %283 : vector<8x32xf32>
    %285 = arith.index_cast %c6_i32 : i32 to index
    %c0_123 = arith.constant 0 : index
    %c0_124 = arith.constant 0 : index
    %286 = vector.load %arg8[%285, %c0_123, %c0_124] : memref<8x8x32xf32, #tpu.memory_space<vmem>>, vector<1x8x32xf32>
    %287 = vector.shape_cast %286 : vector<1x8x32xf32> to vector<8x32xf32>
    %cst_125 = arith.constant dense<0.000000e+00> : vector<8x32xf32>
    %288 = tpu.matmul %274, %22, %cst_125 {dimension_numbers = #tpu.dot_dimension_numbers<[1], [0], [0], [1], [0, 0, 1, 1], [], []>} : vector<8x32xf32>, vector<32x32xf32>, vector<8x32xf32> -> vector<8x32xf32>
    %289 = arith.addf %287, %288 : vector<8x32xf32>
    %290 = arith.negf %289 : vector<8x32xf32>
    %291 = math.exp %290 : vector<8x32xf32>
    %cst_126 = arith.constant 1.000000e+00 : f32
    %292 = vector.broadcast %cst_126 : f32 to vector<8x32xf32>
    %293 = arith.addf %292, %291 : vector<8x32xf32>
    %294 = arith.divf %292, %293 : vector<8x32xf32>
    %295 = arith.index_cast %c6_i32 : i32 to index
    %c0_127 = arith.constant 0 : index
    %c0_128 = arith.constant 0 : index
    %296 = vector.load %arg9[%295, %c0_127, %c0_128] : memref<8x8x32xf32, #tpu.memory_space<vmem>>, vector<1x8x32xf32>
    %297 = vector.shape_cast %296 : vector<1x8x32xf32> to vector<8x32xf32>
    %cst_129 = arith.constant dense<0.000000e+00> : vector<8x32xf32>
    %298 = tpu.matmul %274, %24, %cst_129 {dimension_numbers = #tpu.dot_dimension_numbers<[1], [0], [0], [1], [0, 0, 1, 1], [], []>} : vector<8x32xf32>, vector<32x32xf32>, vector<8x32xf32> -> vector<8x32xf32>
    %299 = arith.addf %297, %298 : vector<8x32xf32>
    %300 = math.tanh %299 : vector<8x32xf32>
    %301 = arith.index_cast %c6_i32 : i32 to index
    %c0_130 = arith.constant 0 : index
    %c0_131 = arith.constant 0 : index
    %302 = vector.load %arg10[%301, %c0_130, %c0_131] : memref<8x8x32xf32, #tpu.memory_space<vmem>>, vector<1x8x32xf32>
    %303 = vector.shape_cast %302 : vector<1x8x32xf32> to vector<8x32xf32>
    %cst_132 = arith.constant dense<0.000000e+00> : vector<8x32xf32>
    %304 = tpu.matmul %274, %26, %cst_132 {dimension_numbers = #tpu.dot_dimension_numbers<[1], [0], [0], [1], [0, 0, 1, 1], [], []>} : vector<8x32xf32>, vector<32x32xf32>, vector<8x32xf32> -> vector<8x32xf32>
    %305 = arith.addf %303, %304 : vector<8x32xf32>
    %306 = arith.negf %305 : vector<8x32xf32>
    %307 = math.exp %306 : vector<8x32xf32>
    %cst_133 = arith.constant 1.000000e+00 : f32
    %308 = vector.broadcast %cst_133 : f32 to vector<8x32xf32>
    %309 = arith.addf %308, %307 : vector<8x32xf32>
    %310 = arith.divf %308, %309 : vector<8x32xf32>
    %311 = arith.mulf %294, %272 : vector<8x32xf32>
    %312 = arith.mulf %284, %300 : vector<8x32xf32>
    %313 = arith.addf %311, %312 : vector<8x32xf32>
    %314 = math.tanh %313 : vector<8x32xf32>
    %315 = arith.mulf %310, %314 : vector<8x32xf32>
    %c7_i32 = arith.constant 7 : i32
    %316 = arith.index_cast %c7_i32 : i32 to index
    %c0_134 = arith.constant 0 : index
    %c0_135 = arith.constant 0 : index
    %317 = vector.load %arg7[%316, %c0_134, %c0_135] : memref<8x8x32xf32, #tpu.memory_space<vmem>>, vector<1x8x32xf32>
    %318 = vector.shape_cast %317 : vector<1x8x32xf32> to vector<8x32xf32>
    %cst_136 = arith.constant dense<0.000000e+00> : vector<8x32xf32>
    %319 = tpu.matmul %315, %20, %cst_136 {dimension_numbers = #tpu.dot_dimension_numbers<[1], [0], [0], [1], [0, 0, 1, 1], [], []>} : vector<8x32xf32>, vector<32x32xf32>, vector<8x32xf32> -> vector<8x32xf32>
    %320 = arith.addf %318, %319 : vector<8x32xf32>
    %321 = arith.negf %320 : vector<8x32xf32>
    %322 = math.exp %321 : vector<8x32xf32>
    %cst_137 = arith.constant 1.000000e+00 : f32
    %323 = vector.broadcast %cst_137 : f32 to vector<8x32xf32>
    %324 = arith.addf %323, %322 : vector<8x32xf32>
    %325 = arith.divf %323, %324 : vector<8x32xf32>
    %326 = arith.index_cast %c7_i32 : i32 to index
    %c0_138 = arith.constant 0 : index
    %c0_139 = arith.constant 0 : index
    %327 = vector.load %arg8[%326, %c0_138, %c0_139] : memref<8x8x32xf32, #tpu.memory_space<vmem>>, vector<1x8x32xf32>
    %328 = vector.shape_cast %327 : vector<1x8x32xf32> to vector<8x32xf32>
    %cst_140 = arith.constant dense<0.000000e+00> : vector<8x32xf32>
    %329 = tpu.matmul %315, %22, %cst_140 {dimension_numbers = #tpu.dot_dimension_numbers<[1], [0], [0], [1], [0, 0, 1, 1], [], []>} : vector<8x32xf32>, vector<32x32xf32>, vector<8x32xf32> -> vector<8x32xf32>
    %330 = arith.addf %328, %329 : vector<8x32xf32>
    %331 = arith.negf %330 : vector<8x32xf32>
    %332 = math.exp %331 : vector<8x32xf32>
    %cst_141 = arith.constant 1.000000e+00 : f32
    %333 = vector.broadcast %cst_141 : f32 to vector<8x32xf32>
    %334 = arith.addf %333, %332 : vector<8x32xf32>
    %335 = arith.divf %333, %334 : vector<8x32xf32>
    %336 = arith.index_cast %c7_i32 : i32 to index
    %c0_142 = arith.constant 0 : index
    %c0_143 = arith.constant 0 : index
    %337 = vector.load %arg9[%336, %c0_142, %c0_143] : memref<8x8x32xf32, #tpu.memory_space<vmem>>, vector<1x8x32xf32>
    %338 = vector.shape_cast %337 : vector<1x8x32xf32> to vector<8x32xf32>
    %cst_144 = arith.constant dense<0.000000e+00> : vector<8x32xf32>
    %339 = tpu.matmul %315, %24, %cst_144 {dimension_numbers = #tpu.dot_dimension_numbers<[1], [0], [0], [1], [0, 0, 1, 1], [], []>} : vector<8x32xf32>, vector<32x32xf32>, vector<8x32xf32> -> vector<8x32xf32>
    %340 = arith.addf %338, %339 : vector<8x32xf32>
    %341 = math.tanh %340 : vector<8x32xf32>
    %342 = arith.index_cast %c7_i32 : i32 to index
    %c0_145 = arith.constant 0 : index
    %c0_146 = arith.constant 0 : index
    %343 = vector.load %arg10[%342, %c0_145, %c0_146] : memref<8x8x32xf32, #tpu.memory_space<vmem>>, vector<1x8x32xf32>
    %344 = vector.shape_cast %343 : vector<1x8x32xf32> to vector<8x32xf32>
    %cst_147 = arith.constant dense<0.000000e+00> : vector<8x32xf32>
    %345 = tpu.matmul %315, %26, %cst_147 {dimension_numbers = #tpu.dot_dimension_numbers<[1], [0], [0], [1], [0, 0, 1, 1], [], []>} : vector<8x32xf32>, vector<32x32xf32>, vector<8x32xf32> -> vector<8x32xf32>
    %346 = arith.addf %344, %345 : vector<8x32xf32>
    %347 = arith.negf %346 : vector<8x32xf32>
    %348 = math.exp %347 : vector<8x32xf32>
    %cst_148 = arith.constant 1.000000e+00 : f32
    %349 = vector.broadcast %cst_148 : f32 to vector<8x32xf32>
    %350 = arith.addf %349, %348 : vector<8x32xf32>
    %351 = arith.divf %349, %350 : vector<8x32xf32>
    %352 = arith.mulf %335, %313 : vector<8x32xf32>
    %353 = arith.mulf %325, %341 : vector<8x32xf32>
    %354 = arith.addf %352, %353 : vector<8x32xf32>
    %355 = math.tanh %354 : vector<8x32xf32>
    %356 = arith.mulf %351, %355 : vector<8x32xf32>
    %c8_i32 = arith.constant 8 : i32
    %357 = vector.extract_strided_slice %356 {offsets = [0, 0], sizes = [2, 32], strides = [1, 1]} : vector<8x32xf32> to vector<2x32xf32>
    %358 = vector.extract_strided_slice %356 {offsets = [2, 0], sizes = [2, 32], strides = [1, 1]} : vector<8x32xf32> to vector<2x32xf32>
    %c0_149 = arith.constant 0 : index
    %c0_150 = arith.constant 0 : index
    %359 = vector.load %arg5[%c0_149, %c0_150] : memref<32x32xf32, #tpu.memory_space<vmem>>, vector<32x32xf32>
    %cst_151 = arith.constant dense<0.000000e+00> : vector<2x32xf32>
    %360 = tpu.matmul %357, %359, %cst_151 {dimension_numbers = #tpu.dot_dimension_numbers<[1], [0], [0], [1], [0, 0, 1, 1], [], []>} : vector<2x32xf32>, vector<32x32xf32>, vector<2x32xf32> -> vector<2x32xf32>
    "tpu.trace_start"() <{level = 10 : i32, message = "bh,ch->bc"}> : () -> ()
    %cst_152 = arith.constant dense<0.000000e+00> : vector<2x2xf32>
    %361 = tpu.matmul %360, %358, %cst_152 {dimension_numbers = #tpu.dot_dimension_numbers<[1], [1], [0], [0], [0, 0, 1, 0], [], []>} : vector<2x32xf32>, vector<2x32xf32>, vector<2x2xf32> -> vector<2x2xf32>
    "tpu.trace_stop"() : () -> ()
    %362 = tpu.iota {dimensions = array<i32: 0>} : vector<2x2xi32>
    %363 = tpu.iota {dimensions = array<i32: 1>} : vector<2x2xi32>
    %364 = arith.cmpi eq, %362, %363 : vector<2x2xi32>
    %cst_153 = arith.constant 0.000000e+00 : f32
    %365 = vector.broadcast %cst_153 : f32 to vector<2x2xf32>
    %366 = arith.select %364, %361, %365 : vector<2x2xi1>, vector<2x2xf32>
    %cst_154 = arith.constant dense<0.000000e+00> : vector<2xf32>
    %367 = vector.multi_reduction <add>, %366, %cst_154 [0] : vector<2x2xf32> to vector<2xf32>
    %368 = vector.shape_cast %367 : vector<2xf32> to vector<1x2xf32>
    %c0_155 = arith.constant 0 : index
    %c0_156 = arith.constant 0 : index
    %369 = vector.load %arg6[%c0_155, %c0_156] : memref<1x2xf32, #tpu.memory_space<vmem>>, vector<1x2xf32>
    tpu.vector_store %arg6[%c0_155, %c0_156], %368 {strides = array<i32>} : memref<1x2xf32, #tpu.memory_space<vmem>>, vector<1x2xf32>,
    return
  }
  func.func @transform_0(%arg0: i32) -> (i32, i32, i32) {
    %c0_i32 = arith.constant 0 : i32
    %c0_i32_0 = arith.constant 0 : i32
    %c0_i32_1 = arith.constant 0 : i32
    %c0_i32_2 = arith.constant 0 : i32
    return %c0_i32, %c0_i32_0, %c0_i32_1 : i32, i32, i32
  }
  func.func @transform_1(%arg0: i32) -> (i32, i32) {
    %c0_i32 = arith.constant 0 : i32
    %c0_i32_0 = arith.constant 0 : i32
    %c0_i32_1 = arith.constant 0 : i32
    return %c0_i32, %c0_i32_0 : i32, i32
  }
  func.func @transform_2(%arg0: i32) -> (i32, i32, i32) {
    %c0_i32 = arith.constant 0 : i32
    %c0_i32_0 = arith.constant 0 : i32
    %c0_i32_1 = arith.constant 0 : i32
    %c0_i32_2 = arith.constant 0 : i32
    return %c0_i32, %c0_i32_0, %c0_i32_1 : i32, i32, i32
  }
  func.func @transform_3(%arg0: i32) -> (i32, i32) {
    %c0_i32 = arith.constant 0 : i32
    %c0_i32_0 = arith.constant 0 : i32
    %c0_i32_1 = arith.constant 0 : i32
    return %c0_i32, %c0_i32_0 : i32, i32
  }
  func.func @transform_4(%arg0: i32) -> (i32, i32) {
    %c0_i32 = arith.constant 0 : i32
    %c0_i32_0 = arith.constant 0 : i32
    %c0_i32_1 = arith.constant 0 : i32
    return %c0_i32, %c0_i32_0 : i32, i32
  }
  func.func @transform_5(%arg0: i32) -> (i32, i32) {
    %c0_i32 = arith.constant 0 : i32
    %c0_i32_0 = arith.constant 0 : i32
    %c0_i32_1 = arith.constant 0 : i32
    return %c0_i32, %c0_i32_0 : i32, i32
  }
}

</mosaic_0001>

<bundles_post_ra>
// kernel: tpu_custom_call.1
= control target key start
LH: loop header
LB: loop body
LE: loop exit
PB: predicated region body
PF: predicated region fallthrough
CT: control target
= control target key end

     0   :  { %10 = vsyncpa [#allocation7], 0  ;;  %s2335_s0 = inlined_call_operand.hbm [shape: f32[8,8,16], index: 0, kind: input, shape index: {}]   ;;  %s2336_s1 = inlined_call_operand.hbm [shape: f32[16,128], index: 1, kind: input, shape index: {}]   ;;  %s2337_s2 = inlined_call_operand.hbm [shape: f32[4,32,32], index: 2, kind: input, shape index: {}]   ;;  %s2338_s3 = inlined_call_operand.vmem [shape: f32[1,128], index: 3, kind: input, shape index: {}]   ;;  %s2339_s4 = inlined_call_operand.hbm [shape: f32[32,32], index: 4, kind: input, shape index: {}]   ;;  %s2340_s5 = inlined_call_operand.hbm [shape: f32[1,2], index: 5, kind: output, shape index: {}]  }
   0x1   :  { %11 = vsyncpa [#allocation10], 0 }
   0x2   :  { %12 = vsyncpa [#allocation13], 0 }
   0x3   :  { %13 = vsyncpa [#allocation8], 0  ;;  %s31_s20 = sshll.u32 %s2336_s1, 4  ;;  %s1988_s21 = smov [#allocation9]   ;;  %s32_s20 = int_to_ptr.hbm [resolvable:$true] %s31_s20 }
   0x4   :  { %s33_s22 = sshll.u32 %s1988_s21, 4  ;;  %s18_s25 = sshll.u32 %s2335_s0, 4  ;;  %s34_s22 = int_to_ptr.vmem [resolvable:$true] %s33_s22  ;;  %s19_s25 = int_to_ptr.hbm [resolvable:$true] %s18_s25 }
   0x5   :  { %s1989_s26 = smov 128   ;;  %s1990_s27 = smov 8  }
   0x6   :  { %39 = dma.hbm_to_vmem [thread:$0]  %s32_s20, 256, %s34_s22, [#allocation10], %s1989_s26, %s1989_s26, %s1990_s27  }
   0x7   :  { %s1991_s28 = smov [#allocation6]   ;;  %s44_s7 = sshll.u32 %s2337_s2, 4  ;;  %s45_s7 = int_to_ptr.hbm [resolvable:$true] %s44_s7 }
   0x8   :  { %s20_s29 = sshll.u32 %s1991_s28, 4  ;;  %s59_s9 = sshll.u32 %s2339_s4, 4  ;;  %s21_s29 = int_to_ptr.vmem [resolvable:$true] %s20_s29  ;;  %s60_s9 = int_to_ptr.hbm [resolvable:$true] %s59_s9 }
   0x9   :  { %26 = dma.hbm_to_vmem [thread:$0]  %s19_s25, 1024, %s21_s29, [#allocation7], %s1989_s26, %s1989_s26, %s1990_s27  }
   0xa   :  { %s1992_s10 = smov [#allocation11]   ;;  %s1993_s0 = smov [#allocation12]  }
   0xb   :  { %s46_s11 = sshll.u32 %s1992_s10, 4  ;;  %s61_s12 = sshll.u32 %s1993_s0, 4  ;;  %s47_s11 = int_to_ptr.vmem [resolvable:$true] %s46_s11  ;;  %s62_s12 = int_to_ptr.vmem [resolvable:$true] %s61_s12 }
   0xc   :  { %52 = dma.hbm_to_vmem [thread:$0]  %s45_s7, 2048, %s47_s11, [#allocation10], %s1989_s26, %s1989_s26, %s1990_s27  }
   0xd   :  { %67 = dma.hbm_to_vmem [thread:$0]  %s60_s9, 512, %s62_s12, [#allocation13], %s1989_s26, %s1989_s26, %s1990_s27  }
   0xe   :  { %1980 = dma.done.wait [#allocation7], 1024  }
   0xf   :  { %1981 = vsyncadd [#allocation7], 4294966272 }
  0x10   :  { %1982 = dma.done.wait [#allocation10], 2304  }
  0x11   :  { %1983 = vsyncadd [#allocation10], 4294964992 }
  0x12   :  { %1984 = dma.done.wait [#allocation13], 512  }
  0x13   :  { %1985 = vsyncadd [#allocation13], 4294966784  ;;  %v93_v0 = vld [vmem:[#allocation9 + $0x8] sm:$0xff]  ;;  %v92_v1 = vld [vmem:[#allocation9] sm:$0xff]  ;;  %vm98_vm0 = vcmask 130048   ;;  %v1994_v15 = vmov 0.0  }
  0x14   :  { %137 = vmatpush.msra.mxu0 %v93_v0  ;;  %v84_v2 = vld [vmem:[#allocation6] sm:$0xff]  ;;  %v2041_v3 = vld [vmem:[#allocation11 + $0x18] sm:$0xff]  ;;  %v2050_v7 = vld [vmem:[#allocation11 + $0x8] sm:$0xff]  ;;  %vm164_vm1 = vcmask 261120   ;;  %s1995_s13 = smov 64   ;;  %s1996_s14 = smov 96  }
  0x15   :  { %v2043_v4 = vld [vmem:[#allocation11 + $0x10] sm:$0xff]  ;;  %312 = vmatpush.msra.mxu1 %v2041_v3  ;;  %v2046_v5 = vld [vmem:[#allocation11 + $0x38] sm:$0xff]  ;;  %v2059_v10 = vld [vmem:[#allocation11 + $0x28] sm:$0xff]  ;;  %s1997_s15 = smov 32   ;;  %s1632_s21 = sshll.u32 %s2340_s5, 4  ;;  %s1633_s21 = int_to_ptr.hbm [resolvable:$true] %s1632_s21 }
  0x16   :  { %v2048_v6 = vld [vmem:[#allocation11 + $0x58] sm:$0xff]  ;;  %138 = vmatpush.msra.mxu0 %v92_v1  ;;  %353 = vmatpush.msra.mxu2 %v2046_v5  ;;  %v2053_v8 = vld [vmem:[#allocation11 + $0x30] sm:$0xff]  ;;  %v2061_v11 = vld [vmem:[#allocation11] sm:$0xff] }
  0x17   :  { %1644 = vmatmul.msk.f32.vlgmr.msra.gmra.mxu0 %vm98_vm0, %v84_v2  ;;  %313 = vmatpush.msra.mxu1 %v2043_v4  ;;  %v2057_v9 = vld [vmem:[#allocation11 + $0x50] sm:$0xff]  ;;  %v2066_v12 = vld [vmem:[#allocation11 + $0x48] sm:$0xff]  ;;  %v2071_v13 = vld [vmem:[#allocation11 + $0x20] sm:$0xff] }
  0x18   :  { %394 = vmatpush.msra.mxu3 %v2048_v6  ;;  %354 = vmatpush.msra.mxu2 %v2053_v8  ;;  %v2074_v14 = vld [vmem:[#allocation11 + $0x40] sm:$0xff]  ;;  %v2098_v16 = vld [vmem:[#allocation11 + $0x78] sm:$0xff]  ;;  %v2102_v17 = vld [vmem:[#allocation11 + $0x70] sm:$0xff] }
  0x19   :  { %314 = vmatpush.msra.mxu1 %v2050_v7  ;;  %1257 = vmatpush.msrb.mxu0 %v2041_v3  ;;  %v2105_v18 = vld [vmem:[#allocation11 + $0x68] sm:$0xff]  ;;  %v2108_v19 = vld [vmem:[#allocation11 + $0x60] sm:$0xff]  ;;  %v2125_v20 = vld [vmem:[%s2338_s3] ss:$0 sm:$0xff] }
  0x1a   :  { %395 = vmatpush.msra.mxu3 %v2057_v9  ;;  %355 = vmatpush.msra.mxu2 %v2059_v10  ;;  %v85_v23 = vld [vmem:[#allocation6 + $0x8] sm:$0xff]  ;;  %v86_v55 = vld [vmem:[#allocation6 + $0x10] sm:$0xff] }
  0x1b   :  { %315 = vmatpush.msra.mxu1 %v2061_v11  ;;  %1258 = vmatpush.msrb.mxu0 %v2043_v4 }
  0x1c   :  { %316 = vmatmul.f32.vlgmr.msra.gmra.mxu1 %v1994_v15  ;;  %396 = vmatpush.msra.mxu3 %v2066_v12 }
  0x1d   :  { %356 = vmatpush.msra.mxu2 %v2071_v13  ;;  %1259 = vmatpush.msrb.mxu0 %v2050_v7 }
  0x1e   :  { %397 = vmatpush.msra.mxu3 %v2074_v14  ;;  %357 = vmatmul.f32.vlgmr.msra.gmra.mxu2 %v1994_v15 }
  0x1f   :  { %398 = vmatmul.f32.vlgmr.msra.gmra.mxu3 %v1994_v15  ;;  %467 = vmatpush.msrb.mxu2 %v2041_v3 }
  0x20   :  { %509 = vmatpush.msrb.mxu3 %v2046_v5  ;;  %1260 = vmatpush.msrb.mxu0 %v2061_v11 }
  0x21   :  { %468 = vmatpush.msrb.mxu2 %v2043_v4  ;;  %417 = vmatpush.msrb.mxu1 %v2098_v16 }
  0x22   :  { %1415 = vmatpush.msra.mxu0 %v2041_v3  ;;  %510 = vmatpush.msrb.mxu3 %v2053_v8 }
  0x23   :  { %469 = vmatpush.msrb.mxu2 %v2050_v7  ;;  %418 = vmatpush.msrb.mxu1 %v2102_v17 }
  0x24   :  { %1416 = vmatpush.msra.mxu0 %v2043_v4  ;;  %511 = vmatpush.msrb.mxu3 %v2059_v10 }
  0x25   :  { %470 = vmatpush.msrb.mxu2 %v2061_v11  ;;  %419 = vmatpush.msrb.mxu1 %v2105_v18 }
  0x26   :  { %1417 = vmatpush.msra.mxu0 %v2050_v7  ;;  %512 = vmatpush.msrb.mxu3 %v2071_v13 }
  0x27   :  { %575 = vmatpush.msra.mxu2 %v2098_v16  ;;  %420 = vmatpush.msrb.mxu1 %v2108_v19 }
  0x28   :  { %625 = vmatpush.msra.mxu3 %v2041_v3  ;;  %1418 = vmatpush.msra.mxu0 %v2061_v11 }
  0x29   :  { %576 = vmatpush.msra.mxu2 %v2102_v17  ;;  %421 = vmatmul.f32.vlgmr.msrb.gmra.mxu1 %v1994_v15 }
  0x2a   :  { %626 = vmatpush.msra.mxu3 %v2043_v4  ;;  %551 = vmatpush.msra.mxu1 %v2048_v6 }
  0x2b   :  { %577 = vmatpush.msra.mxu2 %v2105_v18  ;;  %1645 = vmatmul.msk.f32.gmra.mxu0 %vm98_vm0, %v85_v23 }
  0x2c   :  { %627 = vmatpush.msra.mxu3 %v2050_v7  ;;  %552 = vmatpush.msra.mxu1 %v2057_v9 }
  0x2d   :  { %578 = vmatpush.msra.mxu2 %v2108_v19 }
  0x2e   :  { %628 = vmatpush.msra.mxu3 %v2061_v11  ;;  %553 = vmatpush.msra.mxu1 %v2066_v12 }
  0x30   :  { %554 = vmatpush.msra.mxu1 %v2074_v14 }
  0x32   :  { %667 = vmatpush.msrb.mxu1 %v2046_v5 }
  0x33   :  { %1646 = vmatmul.msk.f32.gmra.mxu0 %vm98_vm0, %v86_v55 }
  0x34   :  { %668 = vmatpush.msrb.mxu1 %v2053_v8 }
  0x36   :  { %669 = vmatpush.msrb.mxu1 %v2059_v10 }
  0x38   :  { %670 = vmatpush.msrb.mxu1 %v2071_v13 }
  0x94   :  { %v140_v21 = vpop.f32.mrf.mxu0 }
  0x95   :  { %v141_v22 = vadd.f32 %v2125_v20, %v140_v21 }
  0x97   :  { %165 = vst.msk [vmem:[#allocation2] sm:$0xff] %vm164_vm1, %v141_v22  ;;  %213 = vrot.lane.b32.xlu1 %v141_v22, %s1995_s13  ;;  %181 = vrot.lane.b32.xlu0 %v141_v22, %s1996_s14 }
  0x99   :  { %v317_v25 = vpop.f32.mrf.mxu1 }
  0x9e   :  { %v296_v24 = vld [vmem:[#allocation2] sm:$0xff] }
  0x9f   :  { %245 = vrot.lane.b32.xlu0 %v141_v22, %s1997_s15  ;;  %v320_v26 = vadd.f32 %v317_v25, %v296_v24 }
  0xa1   :  { %v1652_v27 = vmul.f32 -1.442695, %v320_v26  ;;  %v358_v32 = vpop.f32.mrf.mxu2 }
  0xa2   :  { %v399_v49 = vpop.f32.mrf.mxu3 }
  0xa3   :  { %1719 = vpow2.f32 %v1652_v27 }
  0xa6   :  { %v422_v39 = vpop.f32.mrf.mxu1 }
  0xa8   :  { %v143_v37 = vpop.f32.mrf.mxu0 }
  0xa9   :  { %v1720_v30 = vpop.eup %1719  ;;  %v144_v38 = vadd.f32 %v2125_v20, %v143_v37 }
  0xaa   :  { %v324_v31 = vadd.f32 1.0, %v1720_v30 }
  0xab   :  { %166 = vst.msk [vmem:[#allocation2 + $0x8] sm:$0xff] %vm164_vm1, %v144_v38  ;;  %247 = vrot.lane.b32.xlu2 %v144_v38, %s1997_s15  ;;  %183 = vrot.lane.b32.xlu1 %v144_v38, %s1996_s14 }
  0xac   :  { %1721 = vrcp.f32 %v324_v31  ;;  %vm330_vm3 = vweird.f32 %v324_v31  ;;  %v336_v60 = vand.u32 2147483648, %v324_v31  ;;  %v334_v62 = vand.u32 2147483647, %v324_v31 }
  0xae   :  { %v337_v22 = vor.u32 1.1754944e-38, %v336_v60  ;;  %vm335_vm8 = vcmp.eq.f32.partialorder %v334_v62, 8.507059e+37 }
  0xb2   :  { %v1722_v41 = vpop.eup %1721 }
  0xb3   :  { %v326_v45 = vmul.f32 %v1722_v41, %v324_v31  ;;  %215 = vrot.lane.b32.xlu2 %v144_v38, %s1995_s13  ;;  %vm331_vm2 = vweird.f32 %v1722_v41 }
  0xb4   :  { %vm332_vm5 = vmor %vm330_vm3, %vm331_vm2 }
  0xb5   :  { %v327_v47 = vsub.f32 1.0, %v326_v45 }
  0xb7   :  { %v328_v52 = vmul.f32 %v1722_v41, %v327_v47 }
  0xb9   :  { %v329_v58 = vadd.f32 %v1722_v41, %v328_v52 }
  0xbb   :  { %v333_v1 = vsel %vm332_vm5, %v1722_v41, %v329_v58 }
  0xbc   :  { %v338_v25 = vsel %vm335_vm8, %v337_v22, %v333_v1  ;;  %v87_v22 = vld [vmem:[#allocation6 + $0x18] sm:$0xff] }
  0xbd   :  { %1647 = vmatmul.msk.f32.gmra.mxu0 %vm98_vm0, %v87_v22 }
 0x109   :  { %v214_v28 = vpop.permute.xlu1 %213  ;;  %v182_v29 = vpop.permute.xlu0 %181 }
 0x10a   :  { %237 = vst.msk [vmem:[#allocation4] sm:$0xff] %vm164_vm1, %v214_v28 }
 0x10b   :  { %205 = vst.msk [vmem:[#allocation3] sm:$0xff] %vm164_vm1, %v182_v29 }
 0x111   :  { %v246_v33 = vpop.permute.xlu0 %245  ;;  %v381_v48 = vld [vmem:[#allocation4] sm:$0xff] }
 0x112   :  { %v340_v34 = vld [vmem:[#allocation3] sm:$0xff]  ;;  %269 = vst.msk [vmem:[#allocation5] sm:$0xff] %vm164_vm1, %v246_v33  ;;  %v402_v51 = vadd.f32 %v399_v49, %v381_v48  ;;  %v146_v49 = vpop.f32.mrf.mxu0 }
 0x113   :  { %v361_v35 = vadd.f32 %v358_v32, %v340_v34 }
 0x115   :  { %v1653_v36 = vmul.f32 -1.442695, %v361_v35 }
 0x117   :  { %1723 = vpow2.f32 %v1653_v36 }
 0x119   :  { %v404_v40 = vld [vmem:[#allocation5] sm:$0xff] }
 0x11a   :  { %v425_v42 = vadd.f32 %v422_v39, %v404_v40  ;;  %v248_v40 = vpop.permute.xlu2 %247 }
 0x11b   :  { %270 = vst.msk [vmem:[#allocation5 + $0x8] sm:$0xff] %vm164_vm1, %v248_v40 }
 0x11c   :  { %v1654_v43 = vmul.f32 -1.442695, %v425_v42 }
 0x11d   :  { %v1724_v44 = vpop.eup %1723  ;;  %v184_v42 = vpop.permute.xlu1 %183 }
 0x11e   :  { %v365_v46 = vadd.f32 1.0, %v1724_v44  ;;  %1725 = vpow2.f32 %v1654_v43  ;;  %206 = vst.msk [vmem:[#allocation3 + $0x8] sm:$0xff] %vm164_vm1, %v184_v42  ;;  %v451_v44 = vld [vmem:[#allocation2 + $0x8] sm:$0xff] }
 0x120   :  { %1727 = vrcp.f32 %v365_v46  ;;  %v377_v59 = vand.u32 2147483648, %v365_v46  ;;  %v375_v63 = vand.u32 2147483647, %v365_v46  ;;  %vm371_vm6 = vweird.f32 %v365_v46 }
 0x122   :  { %v378_v21 = vor.u32 1.1754944e-38, %v377_v59  ;;  %vm376_vm9 = vcmp.eq.f32.partialorder %v375_v63, 8.507059e+37  ;;  %v216_v41 = vpop.permute.xlu2 %215 }
 0x123   :  { %238 = vst.msk [vmem:[#allocation4 + $0x8] sm:$0xff] %vm164_vm1, %v216_v41 }
 0x124   :  { %v1726_v50 = vpop.eup %1725 }
 0x125   :  { %v429_v53 = vadd.f32 1.0, %v1726_v50  ;;  %v496_v43 = vld [vmem:[#allocation3 + $0x8] sm:$0xff]  ;;  %v147_v50 = vadd.f32 %v2125_v20, %v146_v49 }
 0x126   :  { %v1728_v54 = vpop.eup %1727 }
 0x127   :  { %v367_v56 = vmul.f32 %v1728_v54, %v365_v46  ;;  %1729 = vrcp.f32 %v429_v53  ;;  %vm372_vm4 = vweird.f32 %v1728_v54  ;;  %v441_v33 = vand.u32 2147483648, %v429_v53  ;;  %167 = vst.msk [vmem:[#allocation2 + $0x10] sm:$0xff] %vm164_vm1, %v147_v50  ;;  %185 = vrot.lane.b32.xlu0 %v147_v50, %s1996_s14  ;;  %217 = vrot.lane.b32.xlu2 %v147_v50, %s1995_s13 }
 0x128   :  { %1731 = vtanh.f32 %v402_v51  ;;  %vm373_vm7 = vmor %vm371_vm6, %vm372_vm4  ;;  %vm435_vm11 = vweird.f32 %v429_v53  ;;  %v439_v34 = vand.u32 2147483647, %v429_v53  ;;  %249 = vrot.lane.b32.xlu1 %v147_v50, %s1997_s15 }
 0x129   :  { %v368_v57 = vsub.f32 1.0, %v367_v56  ;;  %v442_v36 = vor.u32 1.1754944e-38, %v441_v33 }
 0x12a   :  { %vm440_vm13 = vcmp.eq.f32.partialorder %v439_v34, 8.507059e+37  ;;  %v538_v63 = vld [vmem:[#allocation4 + $0x8] sm:$0xff] }
 0x12b   :  { %v369_v61 = vmul.f32 %v1728_v54, %v368_v57 }
 0x12d   :  { %v1730_v0 = vpop.eup %1729  ;;  %v370_v2 = vadd.f32 %v1728_v54, %v369_v61 }
 0x12e   :  { %v1732_v15 = vpop.eup %1731  ;;  %v431_v23 = vmul.f32 %v1730_v0, %v429_v53  ;;  %vm436_vm10 = vweird.f32 %v1730_v0  ;;  %v562_v53 = vld [vmem:[#allocation5 + $0x8] sm:$0xff] }
 0x12f   :  { %v374_v24 = vsel %vm373_vm7, %v1728_v54, %v370_v2  ;;  %v446_v29 = vmul.f32 %v1732_v15, %v338_v25  ;;  %vm437_vm12 = vmor %vm435_vm11, %vm436_vm10 }
 0x130   :  { %v379_v26 = vsel %vm376_vm9, %v378_v21, %v374_v24  ;;  %v432_v27 = vsub.f32 1.0, %v431_v23 }
 0x131   :  { %v445_v28 = vmul.f32 0.0, %v379_v26 }
 0x132   :  { %v433_v30 = vmul.f32 %v1730_v0, %v432_v27 }
 0x133   :  { %v2142_v31 = vadd.f32 %v446_v29, %v445_v28 }
 0x134   :  { %v434_v32 = vadd.f32 %v1730_v0, %v433_v30 }
 0x135   :  { %1733 = vtanh.f32 %v2142_v31 }
 0x136   :  { %v438_v35 = vsel %vm437_vm12, %v1730_v0, %v434_v32 }
 0x137   :  { %v443_v38 = vsel %vm440_vm13, %v442_v36, %v438_v35 }
 0x13b   :  { %v1734_v37 = vpop.eup %1733 }
 0x13c   :  { %v449_v39 = vmul.f32 %v1734_v37, %v443_v38 }
 0x13e   :  { %1655 = vmatmul.msk.f32.vlgmr.msrb.gmra.mxu2 %vm164_vm1, %v449_v39  ;;  %1657 = vmatmul.msk.f32.vlgmr.msrb.gmra.mxu3 %vm164_vm1, %v449_v39 }
 0x13f   :  { %1659 = vmatmul.msk.f32.vlgmr.msra.gmra.mxu1 %vm164_vm1, %v449_v39  ;;  %709 = vmatpush.msrb.mxu2 %v2048_v6 }
 0x140   :  { %733 = vmatpush.msrb.mxu3 %v2098_v16  ;;  %783 = vmatpush.msra.mxu1 %v2041_v3 }
 0x141   :  { %710 = vmatpush.msrb.mxu2 %v2057_v9 }
 0x142   :  { %734 = vmatpush.msrb.mxu3 %v2102_v17  ;;  %784 = vmatpush.msra.mxu1 %v2043_v4 }
 0x143   :  { %711 = vmatpush.msrb.mxu2 %v2066_v12 }
 0x144   :  { %735 = vmatpush.msrb.mxu3 %v2105_v18  ;;  %785 = vmatpush.msra.mxu1 %v2050_v7 }
 0x145   :  { %712 = vmatpush.msrb.mxu2 %v2074_v14 }
 0x146   :  { %1660 = vmatmul.msk.f32.vlgmr.msra.gmra.mxu2 %vm164_vm1, %v449_v39  ;;  %736 = vmatpush.msrb.mxu3 %v2108_v19 }
 0x147   :  { %825 = vmatpush.msra.mxu2 %v2046_v5  ;;  %786 = vmatpush.msra.mxu1 %v2061_v11 }
 0x149   :  { %826 = vmatpush.msra.mxu2 %v2053_v8 }
 0x14b   :  { %827 = vmatpush.msra.mxu2 %v2059_v10 }
 0x14d   :  { %828 = vmatpush.msra.mxu2 %v2071_v13 }
 0x1bc   :  { %v556_v61 = vpop.f32.mrf.mxu1 }
 0x1bd   :  { %v559_v1 = vadd.f32 %v556_v61, %v538_v63  ;;  %v609_v63 = vld [vmem:[#allocation2 + $0x10] sm:$0xff] }
 0x1c1   :  { %v472_v45 = vpop.f32.mrf.mxu2  ;;  %v514_v46 = vpop.f32.mrf.mxu3 }
 0x1c2   :  { %v475_v47 = vadd.f32 %v472_v45, %v451_v44  ;;  %v517_v48 = vadd.f32 %v514_v46, %v496_v43 }
 0x1c4   :  { %v1656_v51 = vmul.f32 -1.442695, %v475_v47  ;;  %v1658_v52 = vmul.f32 -1.442695, %v517_v48 }
 0x1c6   :  { %1735 = vpow2.f32 %v1656_v51 }
 0x1c7   :  { %1737 = vpow2.f32 %v1658_v52 }
 0x1c9   :  { %v580_v54 = vpop.f32.mrf.mxu2 }
 0x1ca   :  { %v583_v55 = vadd.f32 %v580_v54, %v562_v53 }
 0x1cc   :  { %v1736_v56 = vpop.eup %1735  ;;  %v1661_v57 = vmul.f32 -1.442695, %v583_v55 }
 0x1cd   :  { %v1738_v58 = vpop.eup %1737  ;;  %v479_v59 = vadd.f32 1.0, %v1736_v56 }
 0x1ce   :  { %v521_v60 = vadd.f32 1.0, %v1738_v58  ;;  %1739 = vpow2.f32 %v1661_v57  ;;  %v186_v57 = vpop.permute.xlu0 %185  ;;  %v250_v58 = vpop.permute.xlu1 %249 }
 0x1cf   :  { %1741 = vrcp.f32 %v479_v59  ;;  %v491_v25 = vand.u32 2147483648, %v479_v59  ;;  %v489_v28 = vand.u32 2147483647, %v479_v59  ;;  %vm485_vm2 = vweird.f32 %v479_v59  ;;  %207 = vst.msk [vmem:[#allocation3 + $0x10] sm:$0xff] %vm164_vm1, %v186_v57 }
 0x1d0   :  { %1743 = vrcp.f32 %v521_v60  ;;  %v533_v29 = vand.u32 2147483648, %v521_v60  ;;  %v531_v32 = vand.u32 2147483647, %v521_v60  ;;  %vm527_vm4 = vweird.f32 %v521_v60  ;;  %271 = vst.msk [vmem:[#allocation5 + $0x10] sm:$0xff] %vm164_vm1, %v250_v58 }
 0x1d1   :  { %v492_v35 = vor.u32 1.1754944e-38, %v491_v25  ;;  %vm490_vm5 = vcmp.eq.f32.partialorder %v489_v28, 8.507059e+37  ;;  %v149_v28 = vpop.f32.mrf.mxu0 }
 0x1d2   :  { %v534_v38 = vor.u32 1.1754944e-38, %v533_v29  ;;  %vm532_vm7 = vcmp.eq.f32.partialorder %v531_v32, 8.507059e+37  ;;  %v150_v32 = vadd.f32 %v2125_v20, %v149_v28 }
 0x1d4   :  { %v1740_v62 = vpop.eup %1739  ;;  %168 = vst.msk [vmem:[#allocation2 + $0x18] sm:$0xff] %vm164_vm1, %v150_v32  ;;  %219 = vrot.lane.b32.xlu2 %v150_v32, %s1995_s13  ;;  %251 = vrot.lane.b32.xlu1 %v150_v32, %s1997_s15 }
 0x1d5   :  { %v1742_v0 = vpop.eup %1741  ;;  %v587_v2 = vadd.f32 1.0, %v1740_v62  ;;  %187 = vrot.lane.b32.xlu0 %v150_v32, %s1996_s14 }
 0x1d6   :  { %v1744_v15 = vpop.eup %1743  ;;  %v481_v21 = vmul.f32 %v1742_v0, %v479_v59  ;;  %vm486_vm14 = vweird.f32 %v1742_v0  ;;  %v654_v59 = vld [vmem:[#allocation3 + $0x10] sm:$0xff] }
 0x1d7   :  { %v523_v23 = vmul.f32 %v1744_v15, %v521_v60  ;;  %1745 = vrcp.f32 %v587_v2  ;;  %vm528_vm15 = vweird.f32 %v1744_v15  ;;  %vm487_vm3 = vmor %vm485_vm2, %vm486_vm14  ;;  %v599_v50 = vand.u32 2147483648, %v587_v2  ;;  %v720_v22 = vld [vmem:[#allocation5 + $0x10] sm:$0xff] }
 0x1d8   :  { %v482_v24 = vsub.f32 1.0, %v481_v21  ;;  %1747 = vtanh.f32 %v559_v1  ;;  %vm529_vm6 = vmor %vm527_vm4, %vm528_vm15  ;;  %vm593_vm9 = vweird.f32 %v587_v2  ;;  %v597_v51 = vand.u32 2147483647, %v587_v2 }
 0x1d9   :  { %v524_v26 = vsub.f32 1.0, %v523_v23  ;;  %v600_v53 = vor.u32 1.1754944e-38, %v599_v50 }
 0x1da   :  { %v483_v27 = vmul.f32 %v1742_v0, %v482_v24  ;;  %vm598_vm11 = vcmp.eq.f32.partialorder %v597_v51, 8.507059e+37 }
 0x1db   :  { %v525_v30 = vmul.f32 %v1744_v15, %v524_v26 }
 0x1dc   :  { %v484_v33 = vadd.f32 %v1742_v0, %v483_v27 }
 0x1dd   :  { %v1746_v34 = vpop.eup %1745  ;;  %v526_v36 = vadd.f32 %v1744_v15, %v525_v30 }
 0x1de   :  { %v488_v37 = vsel %vm487_vm3, %v1742_v0, %v484_v33  ;;  %v589_v39 = vmul.f32 %v1746_v34, %v587_v2  ;;  %v1748_v40 = vpop.eup %1747  ;;  %vm594_vm8 = vweird.f32 %v1746_v34 }
 0x1df   :  { %v493_v41 = vsel %vm490_vm5, %v492_v35, %v488_v37  ;;  %v530_v42 = vsel %vm529_vm6, %v1744_v15, %v526_v36  ;;  %vm595_vm10 = vmor %vm593_vm9, %vm594_vm8 }
 0x1e0   :  { %v604_v43 = vmul.f32 %v1748_v40, %v493_v41  ;;  %v535_v44 = vsel %vm532_vm7, %v534_v38, %v530_v42  ;;  %v590_v45 = vsub.f32 1.0, %v589_v39  ;;  %v88_v41 = vld [vmem:[#allocation6 + $0x20] sm:$0xff] }
 0x1e1   :  { %v603_v46 = vmul.f32 %v535_v44, %v2142_v31  ;;  %v218_v31 = vpop.permute.xlu2 %217  ;;  %1648 = vmatmul.msk.f32.gmra.mxu0 %vm98_vm0, %v88_v41 }
 0x1e2   :  { %v591_v47 = vmul.f32 %v1746_v34, %v590_v45  ;;  %239 = vst.msk [vmem:[#allocation4 + $0x10] sm:$0xff] %vm164_vm1, %v218_v31 }
 0x1e3   :  { %v2175_v48 = vadd.f32 %v604_v43, %v603_v46 }
 0x1e4   :  { %v592_v49 = vadd.f32 %v1746_v34, %v591_v47 }
 0x1e5   :  { %1749 = vtanh.f32 %v2175_v48 }
 0x1e6   :  { %v596_v52 = vsel %vm595_vm10, %v1746_v34, %v592_v49 }
 0x1e7   :  { %v601_v55 = vsel %vm598_vm11, %v600_v53, %v596_v52 }
 0x1e9   :  { %v696_v37 = vld [vmem:[#allocation4 + $0x10] sm:$0xff] }
 0x1eb   :  { %v1750_v54 = vpop.eup %1749 }
 0x1ec   :  { %v607_v56 = vmul.f32 %v1750_v54, %v601_v55 }
 0x1ee   :  { %1662 = vmatmul.msk.f32.vlgmr.msra.gmra.mxu3 %vm164_vm1, %v607_v56  ;;  %1664 = vmatmul.msk.f32.vlgmr.msrb.gmra.mxu1 %vm164_vm1, %v607_v56 }
 0x1ef   :  { %1666 = vmatmul.msk.f32.vlgmr.msrb.gmra.mxu2 %vm164_vm1, %v607_v56  ;;  %867 = vmatpush.msra.mxu3 %v2048_v6 }
 0x1f0   :  { %891 = vmatpush.msrb.mxu1 %v2098_v16  ;;  %941 = vmatpush.msrb.mxu2 %v2041_v3 }
 0x1f1   :  { %868 = vmatpush.msra.mxu3 %v2057_v9 }
 0x1f2   :  { %892 = vmatpush.msrb.mxu1 %v2102_v17  ;;  %942 = vmatpush.msrb.mxu2 %v2043_v4 }
 0x1f3   :  { %869 = vmatpush.msra.mxu3 %v2066_v12 }
 0x1f4   :  { %893 = vmatpush.msrb.mxu1 %v2105_v18  ;;  %943 = vmatpush.msrb.mxu2 %v2050_v7 }
 0x1f5   :  { %870 = vmatpush.msra.mxu3 %v2074_v14 }
 0x1f6   :  { %1667 = vmatmul.msk.f32.vlgmr.msrb.gmra.mxu3 %vm164_vm1, %v607_v56  ;;  %894 = vmatpush.msrb.mxu1 %v2108_v19 }
 0x1f7   :  { %983 = vmatpush.msrb.mxu3 %v2046_v5  ;;  %944 = vmatpush.msrb.mxu2 %v2061_v11 }
 0x1f9   :  { %984 = vmatpush.msrb.mxu3 %v2053_v8 }
 0x1fb   :  { %985 = vmatpush.msrb.mxu3 %v2059_v10 }
 0x1fd   :  { %986 = vmatpush.msrb.mxu3 %v2071_v13 }
 0x26b   :  { %v672_v60 = vpop.f32.mrf.mxu1 }
 0x26c   :  { %v675_v61 = vadd.f32 %v672_v60, %v654_v59 }
 0x26e   :  { %v1665_v62 = vmul.f32 -1.442695, %v675_v61 }
 0x270   :  { %1751 = vpow2.f32 %v1665_v62 }
 0x271   :  { %v630_v0 = vpop.f32.mrf.mxu3 }
 0x272   :  { %v633_v1 = vadd.f32 %v630_v0, %v609_v63  ;;  %v714_v34 = vpop.f32.mrf.mxu2 }
 0x273   :  { %v717_v39 = vadd.f32 %v714_v34, %v696_v37 }
 0x274   :  { %v1663_v2 = vmul.f32 -1.442695, %v633_v1 }
 0x276   :  { %v1752_v15 = vpop.eup %1751  ;;  %1753 = vpow2.f32 %v1663_v2 }
 0x277   :  { %v679_v21 = vadd.f32 1.0, %v1752_v15 }
 0x279   :  { %1755 = vrcp.f32 %v679_v21  ;;  %v738_v23 = vpop.f32.mrf.mxu3  ;;  %v691_v44 = vand.u32 2147483648, %v679_v21  ;;  %vm685_vm13 = vweird.f32 %v679_v21  ;;  %v689_v46 = vand.u32 2147483647, %v679_v21 }
 0x27a   :  { %v741_v24 = vadd.f32 %v738_v23, %v720_v22 }
 0x27b   :  { %v692_v52 = vor.u32 1.1754944e-38, %v691_v44  ;;  %vm690_vm3 = vcmp.eq.f32.partialorder %v689_v46, 8.507059e+37 }
 0x27c   :  { %v1754_v25 = vpop.eup %1753  ;;  %v1668_v26 = vmul.f32 -1.442695, %v741_v24 }
 0x27d   :  { %v637_v27 = vadd.f32 1.0, %v1754_v25 }
 0x27e   :  { %1757 = vpow2.f32 %v1668_v26 }
 0x27f   :  { %v1756_v29 = vpop.eup %1755  ;;  %1759 = vrcp.f32 %v637_v27  ;;  %v649_v47 = vand.u32 2147483648, %v637_v27  ;;  %v647_v50 = vand.u32 2147483647, %v637_v27  ;;  %vm643_vm2 = vweird.f32 %v637_v27 }
 0x280   :  { %v681_v30 = vmul.f32 %v1756_v29, %v679_v21  ;;  %vm686_vm12 = vweird.f32 %v1756_v29 }
 0x281   :  { %vm687_vm14 = vmor %vm685_vm13, %vm686_vm12  ;;  %v650_v55 = vor.u32 1.1754944e-38, %v649_v47  ;;  %vm648_vm5 = vcmp.eq.f32.partialorder %v647_v50, 8.507059e+37 }
 0x282   :  { %v682_v33 = vsub.f32 1.0, %v681_v30 }
 0x284   :  { %v1758_v35 = vpop.eup %1757  ;;  %v683_v36 = vmul.f32 %v1756_v29, %v682_v33 }
 0x285   :  { %v1760_v38 = vpop.eup %1759  ;;  %v745_v40 = vadd.f32 1.0, %v1758_v35 }
 0x286   :  { %v639_v42 = vmul.f32 %v1760_v38, %v637_v27  ;;  %v684_v43 = vadd.f32 %v1756_v29, %v683_v36  ;;  %vm644_vm15 = vweird.f32 %v1760_v38 }
 0x287   :  { %1761 = vrcp.f32 %v745_v40  ;;  %vm645_vm4 = vmor %vm643_vm2, %vm644_vm15  ;;  %v757_v1 = vand.u32 2147483648, %v745_v40  ;;  %vm751_vm7 = vweird.f32 %v745_v40  ;;  %v755_v15 = vand.u32 2147483647, %v745_v40 }
 0x288   :  { %v640_v45 = vsub.f32 1.0, %v639_v42  ;;  %1763 = vtanh.f32 %v717_v39  ;;  %v688_v51 = vsel %vm687_vm14, %v1756_v29, %v684_v43  ;;  %v152_v42 = vpop.f32.mrf.mxu0 }
 0x289   :  { %v693_v56 = vsel %vm690_vm3, %v692_v52, %v688_v51  ;;  %v758_v22 = vor.u32 1.1754944e-38, %v757_v1  ;;  %vm756_vm9 = vcmp.eq.f32.partialorder %v755_v15, 8.507059e+37  ;;  %v153_v46 = vadd.f32 %v2125_v20, %v152_v42 }
 0x28a   :  { %v641_v49 = vmul.f32 %v1760_v38, %v640_v45  ;;  %v761_v60 = vmul.f32 %v693_v56, %v2175_v48  ;;  %v767_v48 = vld [vmem:[#allocation2 + $0x18] sm:$0xff] }
 0x28b   :  { %169 = vst.msk [vmem:[#allocation2 + $0x20] sm:$0xff] %vm164_vm1, %v153_v46  ;;  %221 = vrot.lane.b32.xlu2 %v153_v46, %s1995_s13  ;;  %253 = vrot.lane.b32.xlu1 %v153_v46, %s1997_s15 }
 0x28c   :  { %v642_v53 = vadd.f32 %v1760_v38, %v641_v49  ;;  %189 = vrot.lane.b32.xlu0 %v153_v46, %s1996_s14 }
 0x28d   :  { %v1762_v54 = vpop.eup %1761 }
 0x28e   :  { %v646_v31 = vsel %vm645_vm4, %v1760_v38, %v642_v53  ;;  %v747_v57 = vmul.f32 %v1762_v54, %v745_v40  ;;  %v1764_v58 = vpop.eup %1763  ;;  %vm752_vm6 = vweird.f32 %v1762_v54 }
 0x28f   :  { %v651_v59 = vsel %vm648_vm5, %v650_v55, %v646_v31  ;;  %vm753_vm8 = vmor %vm751_vm7, %vm752_vm6 }
 0x290   :  { %v762_v61 = vmul.f32 %v1764_v58, %v651_v59  ;;  %v748_v62 = vsub.f32 1.0, %v747_v57 }
 0x292   :  { %v2208_v63 = vadd.f32 %v762_v61, %v761_v60  ;;  %v749_v0 = vmul.f32 %v1762_v54, %v748_v62 }
 0x294   :  { %1765 = vtanh.f32 %v2208_v63  ;;  %v750_v2 = vadd.f32 %v1762_v54, %v749_v0 }
 0x296   :  { %v754_v21 = vsel %vm753_vm8, %v1762_v54, %v750_v2  ;;  %v89_v54 = vld [vmem:[#allocation6 + $0x28] sm:$0xff] }
 0x297   :  { %v759_v24 = vsel %vm756_vm9, %v758_v22, %v754_v21  ;;  %1649 = vmatmul.msk.f32.gmra.mxu0 %vm98_vm0, %v89_v54 }
 0x29a   :  { %v1766_v23 = vpop.eup %1765 }
 0x29b   :  { %v765_v25 = vmul.f32 %v1766_v23, %v759_v24 }
 0x29d   :  { %1669 = vmatmul.msk.f32.vlgmr.msra.gmra.mxu1 %vm164_vm1, %v765_v25  ;;  %1671 = vmatmul.msk.f32.vlgmr.msra.gmra.mxu2 %vm164_vm1, %v765_v25 }
 0x29e   :  { %1673 = vmatmul.msk.f32.vlgmr.msra.gmra.mxu3 %vm164_vm1, %v765_v25  ;;  %1025 = vmatpush.msra.mxu1 %v2048_v6 }
 0x29f   :  { %1049 = vmatpush.msra.mxu2 %v2098_v16  ;;  %1099 = vmatpush.msra.mxu3 %v2041_v3  ;;  %v220_v3 = vpop.permute.xlu2 %219 }
 0x2a0   :  { %1026 = vmatpush.msra.mxu1 %v2057_v9  ;;  %240 = vst.msk [vmem:[#allocation4 + $0x18] sm:$0xff] %vm164_vm1, %v220_v3 }
 0x2a1   :  { %1050 = vmatpush.msra.mxu2 %v2102_v17  ;;  %1100 = vmatpush.msra.mxu3 %v2043_v4  ;;  %v252_v4 = vpop.permute.xlu1 %251 }
 0x2a2   :  { %1027 = vmatpush.msra.mxu1 %v2066_v12  ;;  %272 = vst.msk [vmem:[#allocation5 + $0x18] sm:$0xff] %vm164_vm1, %v252_v4 }
 0x2a3   :  { %1051 = vmatpush.msra.mxu2 %v2105_v18  ;;  %1101 = vmatpush.msra.mxu3 %v2050_v7  ;;  %v188_v7 = vpop.permute.xlu0 %187 }
 0x2a4   :  { %1028 = vmatpush.msra.mxu1 %v2074_v14  ;;  %208 = vst.msk [vmem:[#allocation3 + $0x18] sm:$0xff] %vm164_vm1, %v188_v7 }
 0x2a5   :  { %1674 = vmatmul.msk.f32.vlgmr.msrb.gmra.mxu1 %vm164_vm1, %v765_v25  ;;  %1052 = vmatpush.msra.mxu2 %v2108_v19 }
 0x2a6   :  { %1141 = vmatpush.msrb.mxu1 %v2046_v5  ;;  %1102 = vmatpush.msra.mxu3 %v2061_v11 }
 0x2a7   :  { %v854_v51 = vld [vmem:[#allocation4 + $0x18] sm:$0xff] }
 0x2a8   :  { %1142 = vmatpush.msrb.mxu1 %v2053_v8 }
 0x2a9   :  { %v878_v32 = vld [vmem:[#allocation5 + $0x18] sm:$0xff] }
 0x2aa   :  { %1143 = vmatpush.msrb.mxu1 %v2059_v10 }
 0x2ab   :  { %v812_v11 = vld [vmem:[#allocation3 + $0x18] sm:$0xff] }
 0x2ac   :  { %1144 = vmatpush.msrb.mxu1 %v2071_v13 }
 0x31a   :  { %v788_v26 = vpop.f32.mrf.mxu1 }
 0x31b   :  { %v791_v27 = vadd.f32 %v788_v26, %v767_v48 }
 0x31d   :  { %v1670_v28 = vmul.f32 -1.442695, %v791_v27 }
 0x31f   :  { %1767 = vpow2.f32 %v1670_v28 }
 0x320   :  { %v830_v29 = vpop.f32.mrf.mxu2 }
 0x321   :  { %v833_v30 = vadd.f32 %v830_v29, %v812_v11  ;;  %v872_v49 = vpop.f32.mrf.mxu3 }
 0x322   :  { %v896_v33 = vpop.f32.mrf.mxu1  ;;  %v875_v53 = vadd.f32 %v872_v49, %v854_v51 }
 0x323   :  { %v1672_v34 = vmul.f32 -1.442695, %v833_v30  ;;  %v899_v35 = vadd.f32 %v896_v33, %v878_v32 }
 0x325   :  { %v1768_v36 = vpop.eup %1767  ;;  %1769 = vpow2.f32 %v1672_v34  ;;  %v1675_v37 = vmul.f32 -1.442695, %v899_v35  ;;  %v155_v35 = vpop.f32.mrf.mxu0 }
 0x326   :  { %v795_v38 = vadd.f32 1.0, %v1768_v36 }
 0x327   :  { %1771 = vpow2.f32 %v1675_v37 }
 0x328   :  { %1773 = vrcp.f32 %v795_v38  ;;  %v807_v31 = vand.u32 2147483648, %v795_v38  ;;  %vm801_vm11 = vweird.f32 %v795_v38  ;;  %v805_v59 = vand.u32 2147483647, %v795_v38 }
 0x32a   :  { %v808_v2 = vor.u32 1.1754944e-38, %v807_v31  ;;  %vm806_vm15 = vcmp.eq.f32.partialorder %v805_v59, 8.507059e+37 }
 0x32b   :  { %v1770_v39 = vpop.eup %1769 }
 0x32c   :  { %v837_v40 = vadd.f32 1.0, %v1770_v39 }
 0x32d   :  { %v1772_v41 = vpop.eup %1771 }
 0x32e   :  { %v1774_v43 = vpop.eup %1773  ;;  %1775 = vrcp.f32 %v837_v40  ;;  %v903_v45 = vadd.f32 1.0, %v1772_v41  ;;  %v849_v60 = vand.u32 2147483648, %v837_v40  ;;  %v847_v1 = vand.u32 2147483647, %v837_v40 }
 0x32f   :  { %v797_v44 = vmul.f32 %v1774_v43, %v795_v38  ;;  %vm802_vm10 = vweird.f32 %v1774_v43  ;;  %vm843_vm14 = vweird.f32 %v837_v40 }
 0x330   :  { %1777 = vrcp.f32 %v903_v45  ;;  %vm803_vm12 = vmor %vm801_vm11, %vm802_vm10  ;;  %v850_v22 = vor.u32 1.1754944e-38, %v849_v60  ;;  %vm848_vm3 = vcmp.eq.f32.partialorder %v847_v1, 8.507059e+37  ;;  %v915_v28 = vand.u32 2147483648, %v903_v45 }
 0x331   :  { %v798_v47 = vsub.f32 1.0, %v797_v44  ;;  %1779 = vtanh.f32 %v875_v53  ;;  %vm909_vm5 = vweird.f32 %v903_v45  ;;  %v913_v11 = vand.u32 2147483647, %v903_v45  ;;  %v90_v53 = vld [vmem:[#allocation6 + $0x30] sm:$0xff] }
 0x332   :  { %v916_v30 = vor.u32 1.1754944e-38, %v915_v28  ;;  %1650 = vmatmul.msk.f32.gmra.mxu0 %vm98_vm0, %v90_v53 }
 0x333   :  { %v799_v50 = vmul.f32 %v1774_v43, %v798_v47  ;;  %vm914_vm7 = vcmp.eq.f32.partialorder %v913_v11, 8.507059e+37 }
 0x334   :  { %v1776_v52 = vpop.eup %1775 }
 0x335   :  { %v839_v55 = vmul.f32 %v1776_v52, %v837_v40  ;;  %v800_v56 = vadd.f32 %v1774_v43, %v799_v50  ;;  %vm844_vm13 = vweird.f32 %v1776_v52 }
 0x336   :  { %v1778_v57 = vpop.eup %1777  ;;  %vm845_vm2 = vmor %vm843_vm14, %vm844_vm13 }
 0x337   :  { %v840_v58 = vsub.f32 1.0, %v839_v55  ;;  %v905_v61 = vmul.f32 %v1778_v57, %v903_v45  ;;  %v804_v0 = vsel %vm803_vm12, %v1774_v43, %v800_v56  ;;  %v1780_v25 = vpop.eup %1779  ;;  %vm910_vm4 = vweird.f32 %v1778_v57 }
 0x338   :  { %v809_v23 = vsel %vm806_vm15, %v808_v2, %v804_v0  ;;  %vm911_vm6 = vmor %vm909_vm5, %vm910_vm4 }
 0x339   :  { %v841_v62 = vmul.f32 %v1776_v52, %v840_v58  ;;  %v906_v15 = vsub.f32 1.0, %v905_v61  ;;  %v920_v48 = vmul.f32 %v1780_v25, %v809_v23 }
 0x33b   :  { %v842_v21 = vadd.f32 %v1776_v52, %v841_v62  ;;  %v907_v4 = vmul.f32 %v1778_v57, %v906_v15 }
 0x33d   :  { %v846_v24 = vsel %vm845_vm2, %v1776_v52, %v842_v21  ;;  %v908_v27 = vadd.f32 %v1778_v57, %v907_v4 }
 0x33e   :  { %v851_v3 = vsel %vm848_vm3, %v850_v22, %v846_v24 }
 0x33f   :  { %v919_v7 = vmul.f32 %v851_v3, %v2208_v63  ;;  %v912_v29 = vsel %vm911_vm6, %v1778_v57, %v908_v27 }
 0x340   :  { %v917_v33 = vsel %vm914_vm7, %v916_v30, %v912_v29 }
 0x341   :  { %v2241_v26 = vadd.f32 %v920_v48, %v919_v7 }
 0x343   :  { %1781 = vtanh.f32 %v2241_v26 }
 0x349   :  { %v1782_v32 = vpop.eup %1781 }
 0x34a   :  { %v923_v34 = vmul.f32 %v1782_v32, %v917_v33 }
 0x34c   :  { %1676 = vmatmul.msk.f32.vlgmr.msrb.gmra.mxu2 %vm164_vm1, %v923_v34  ;;  %1678 = vmatmul.msk.f32.vlgmr.msrb.gmra.mxu3 %vm164_vm1, %v923_v34 }
 0x34d   :  { %1680 = vmatmul.msk.f32.vlgmr.msra.gmra.mxu1 %vm164_vm1, %v923_v34  ;;  %1183 = vmatpush.msrb.mxu2 %v2048_v6  ;;  %v2259_v6 = vld [vmem:[#allocation11 + $0x58] sm:$0xff] }
 0x34e   :  { %1207 = vmatpush.msrb.mxu3 %v2098_v16  ;;  %1299 = vmatpush.msra.mxu1 %v2046_v5  ;;  %v2263_v5 = vld [vmem:[#allocation11 + $0x50] sm:$0xff] }
 0x34f   :  { %1184 = vmatpush.msrb.mxu2 %v2057_v9  ;;  %v254_v9 = vpop.permute.xlu1 %253 }
 0x350   :  { %1208 = vmatpush.msrb.mxu3 %v2102_v17  ;;  %1300 = vmatpush.msra.mxu1 %v2053_v8  ;;  %v222_v8 = vpop.permute.xlu2 %221  ;;  %273 = vst.msk [vmem:[#allocation5 + $0x20] sm:$0xff] %vm164_vm1, %v254_v9  ;;  %v925_v17 = vld [vmem:[#allocation2 + $0x20] sm:$0xff] }
 0x351   :  { %1185 = vmatpush.msrb.mxu2 %v2066_v12  ;;  %241 = vst.msk [vmem:[#allocation4 + $0x20] sm:$0xff] %vm164_vm1, %v222_v8 }
 0x352   :  { %1209 = vmatpush.msrb.mxu3 %v2105_v18  ;;  %1301 = vmatpush.msra.mxu1 %v2059_v10  ;;  %v190_v10 = vpop.permute.xlu0 %189 }
 0x353   :  { %1186 = vmatpush.msrb.mxu2 %v2074_v14  ;;  %209 = vst.msk [vmem:[#allocation3 + $0x20] sm:$0xff] %vm164_vm1, %v190_v10  ;;  %v1850_v10 = vld [vmem:[#allocation11 + $0x38] sm:$0xff] }
 0x354   :  { %1681 = vmatmul.msk.f32.vlgmr.msra.gmra.mxu2 %vm164_vm1, %v923_v34  ;;  %1210 = vmatpush.msrb.mxu3 %v2108_v19 }
 0x355   :  { %1341 = vmatpush.msra.mxu2 %v2259_v6  ;;  %1302 = vmatpush.msra.mxu1 %v2071_v13 }
 0x357   :  { %1342 = vmatpush.msra.mxu2 %v2263_v5  ;;  %v1036_v37 = vld [vmem:[#allocation5 + $0x20] sm:$0xff] }
 0x358   :  { %v1012_v46 = vld [vmem:[#allocation4 + $0x20] sm:$0xff] }
 0x359   :  { %1343 = vmatpush.msra.mxu2 %v2066_v12  ;;  %v156_v12 = vadd.f32 %v2125_v20, %v155_v35  ;;  %v1857_v35 = vld [vmem:[#allocation11 + $0x20] sm:$0xff] }
 0x35a   :  { %v970_v16 = vld [vmem:[#allocation3 + $0x20] sm:$0xff] }
 0x35b   :  { %1344 = vmatpush.msra.mxu2 %v2074_v14  ;;  %170 = vst.msk [vmem:[#allocation2 + $0x28] sm:$0xff] %vm164_vm1, %v156_v12  ;;  %191 = vrot.lane.b32.xlu0 %v156_v12, %s1996_s14 }
 0x35c   :  { %223 = vrot.lane.b32.xlu2 %v156_v12, %s1995_s13  ;;  %255 = vrot.lane.b32.xlu1 %v156_v12, %s1997_s15 }
 0x3b6   :  { %v224_v12 = vpop.permute.xlu2 %223 }
 0x3b7   :  { %242 = vst.msk [vmem:[#allocation4 + $0x28] sm:$0xff] %vm164_vm1, %v224_v12 }
 0x3ca   :  { %v1030_v44 = vpop.f32.mrf.mxu1 }
 0x3cb   :  { %v1033_v49 = vadd.f32 %v1030_v44, %v1012_v46  ;;  %v158_v44 = vpop.f32.mrf.mxu0 }
 0x3cf   :  { %v946_v13 = vpop.f32.mrf.mxu2  ;;  %v988_v18 = vpop.f32.mrf.mxu3 }
 0x3d0   :  { %v949_v19 = vadd.f32 %v946_v13, %v925_v17  ;;  %v991_v63 = vadd.f32 %v988_v18, %v970_v16  ;;  %v1851_v16 = vld [vmem:[#allocation11 + $0x70] sm:$0xff]  ;;  %v1853_v13 = vld [vmem:[#allocation11 + $0x68] sm:$0xff] }
 0x3d1   :  { %v1852_v17 = vld [vmem:[#allocation11 + $0x30] sm:$0xff]  ;;  %v1854_v18 = vld [vmem:[#allocation11 + $0x28] sm:$0xff] }
 0x3d2   :  { %v1677_v36 = vmul.f32 -1.442695, %v949_v19  ;;  %v1679_v14 = vmul.f32 -1.442695, %v991_v63  ;;  %v1855_v19 = vld [vmem:[#allocation11 + $0x48] sm:$0xff]  ;;  %v1856_v63 = vld [vmem:[#allocation11 + $0x60] sm:$0xff] }
 0x3d4   :  { %1783 = vpow2.f32 %v1677_v36  ;;  %v256_v36 = vpop.permute.xlu1 %255 }
 0x3d5   :  { %1785 = vpow2.f32 %v1679_v14  ;;  %274 = vst.msk [vmem:[#allocation5 + $0x28] sm:$0xff] %vm164_vm1, %v256_v36 }
 0x3d7   :  { %v1054_v38 = vpop.f32.mrf.mxu2 }
 0x3d8   :  { %v1057_v39 = vadd.f32 %v1054_v38, %v1036_v37 }
 0x3da   :  { %v1784_v40 = vpop.eup %1783  ;;  %v1682_v41 = vmul.f32 -1.442695, %v1057_v39 }
 0x3db   :  { %v1786_v42 = vpop.eup %1785  ;;  %v953_v43 = vadd.f32 1.0, %v1784_v40  ;;  %v1083_v40 = vld [vmem:[#allocation2 + $0x28] sm:$0xff] }
 0x3dc   :  { %v995_v20 = vadd.f32 1.0, %v1786_v42  ;;  %1787 = vpow2.f32 %v1682_v41 }
 0x3dd   :  { %1789 = vrcp.f32 %v953_v43  ;;  %v965_v56 = vand.u32 2147483648, %v953_v43  ;;  %v963_v58 = vand.u32 2147483647, %v953_v43  ;;  %vm959_vm10 = vweird.f32 %v953_v43 }
 0x3de   :  { %1791 = vrcp.f32 %v995_v20  ;;  %v1007_v59 = vand.u32 2147483648, %v995_v20  ;;  %v1005_v61 = vand.u32 2147483647, %v995_v20  ;;  %vm1001_vm12 = vweird.f32 %v995_v20 }
 0x3df   :  { %v966_v1 = vor.u32 1.1754944e-38, %v965_v56  ;;  %vm964_vm13 = vcmp.eq.f32.partialorder %v963_v58, 8.507059e+37 }
 0x3e0   :  { %v1008_v21 = vor.u32 1.1754944e-38, %v1007_v59  ;;  %vm1006_vm15 = vcmp.eq.f32.partialorder %v1005_v61, 8.507059e+37  ;;  %v1170_v61 = vld [vmem:[#allocation4 + $0x28] sm:$0xff] }
 0x3e2   :  { %v1788_v45 = vpop.eup %1787 }
 0x3e3   :  { %v1790_v47 = vpop.eup %1789  ;;  %v1061_v50 = vadd.f32 1.0, %v1788_v45  ;;  %v2294_v45 = vld [vmem:[%s2338_s3] ss:$0 sm:$0xff]  ;;  %s1998_s3 = smov [#allocation14]  }
 0x3e4   :  { %v1792_v51 = vpop.eup %1791  ;;  %v955_v52 = vmul.f32 %v1790_v47, %v953_v43  ;;  %vm960_vm8 = vweird.f32 %v1790_v47  ;;  %v159_v46 = vadd.f32 %v2294_v45, %v158_v44  ;;  %s1630_s18 = sshll.u32 %s1998_s3, 4  ;;  %s1631_s18 = int_to_ptr.vmem [resolvable:$true] %s1630_s18 }
 0x3e5   :  { %v997_v54 = vmul.f32 %v1792_v51, %v995_v20  ;;  %1793 = vrcp.f32 %v1061_v50  ;;  %vm1002_vm9 = vweird.f32 %v1792_v51  ;;  %vm961_vm11 = vmor %vm959_vm10, %vm960_vm8  ;;  %v1073_v29 = vand.u32 2147483648, %v1061_v50  ;;  %v91_v20 = vld [vmem:[#allocation6 + $0x38] sm:$0xff] }
 0x3e6   :  { %v956_v55 = vsub.f32 1.0, %v955_v52  ;;  %1795 = vtanh.f32 %v1033_v49  ;;  %vm1003_vm14 = vmor %vm1001_vm12, %vm1002_vm9  ;;  %vm1067_vm3 = vweird.f32 %v1061_v50  ;;  %v1071_v30 = vand.u32 2147483647, %v1061_v50  ;;  %1651 = vmatmul.msk.f32.gmra.mxu0 %vm98_vm0, %v91_v20  ;;  %171 = vst.msk [vmem:[#allocation2 + $0x30] sm:$0xff] %vm164_vm1, %v159_v46  ;;  %225 = vrot.lane.b32.xlu2 %v159_v46, %s1995_s13 }
 0x3e7   :  { %v998_v31 = vsub.f32 1.0, %v997_v54  ;;  %v1074_v33 = vor.u32 1.1754944e-38, %v1073_v29  ;;  %257 = vrot.lane.b32.xlu1 %v159_v46, %s1997_s15  ;;  %193 = vrot.lane.b32.xlu0 %v159_v46, %s1996_s14 }
 0x3e8   :  { %v957_v57 = vmul.f32 %v1790_v47, %v956_v55  ;;  %vm1072_vm5 = vcmp.eq.f32.partialorder %v1071_v30, 8.507059e+37 }
 0x3e9   :  { %v999_v60 = vmul.f32 %v1792_v51, %v998_v31 }
 0x3ea   :  { %v958_v62 = vadd.f32 %v1790_v47, %v957_v57 }
 0x3eb   :  { %v1794_v0 = vpop.eup %1793  ;;  %v1000_v2 = vadd.f32 %v1792_v51, %v999_v60 }
 0x3ec   :  { %v962_v15 = vsel %vm961_vm11, %v1790_v47, %v958_v62  ;;  %v1063_v22 = vmul.f32 %v1794_v0, %v1061_v50  ;;  %v1796_v23 = vpop.eup %1795  ;;  %vm1068_vm2 = vweird.f32 %v1794_v0  ;;  %v1194_v50 = vld [vmem:[#allocation5 + $0x28] sm:$0xff] }
 0x3ed   :  { %v967_v24 = vsel %vm964_vm13, %v966_v1, %v962_v15  ;;  %v1004_v25 = vsel %vm1003_vm14, %v1792_v51, %v1000_v2  ;;  %vm1069_vm4 = vmor %vm1067_vm3, %vm1068_vm2 }
 0x3ee   :  { %v1078_v3 = vmul.f32 %v1796_v23, %v967_v24  ;;  %v1009_v4 = vsel %vm1006_vm15, %v1008_v21, %v1004_v25  ;;  %v1064_v7 = vsub.f32 1.0, %v1063_v22 }
 0x3ef   :  { %v1077_v48 = vmul.f32 %v1009_v4, %v2241_v26  ;;  %v1849_v26 = vld [vmem:[#allocation11 + $0x78] sm:$0xff] }
 0x3f0   :  { %v1065_v27 = vmul.f32 %v1794_v0, %v1064_v7 }
 0x3f1   :  { %v2278_v28 = vadd.f32 %v1078_v3, %v1077_v48 }
 0x3f2   :  { %v1066_v11 = vadd.f32 %v1794_v0, %v1065_v27 }
 0x3f3   :  { %1797 = vtanh.f32 %v2278_v28 }
 0x3f4   :  { %v1070_v32 = vsel %vm1069_vm4, %v1794_v0, %v1066_v11 }
 0x3f5   :  { %v1075_v8 = vsel %vm1072_vm5, %v1074_v33, %v1070_v32 }
 0x3f9   :  { %v1798_v34 = vpop.eup %1797 }
 0x3fa   :  { %v1081_v9 = vmul.f32 %v1798_v34, %v1075_v8 }
 0x3fc   :  { %1683 = vmatmul.msk.f32.vlgmr.msra.gmra.mxu3 %vm164_vm1, %v1081_v9  ;;  %1685 = vmatmul.msk.f32.vlgmr.msrb.gmra.mxu1 %vm164_vm1, %v1081_v9 }
 0x3fd   :  { %1687 = vmatmul.msk.f32.vlgmr.msrb.gmra.mxu2 %vm164_vm1, %v1081_v9  ;;  %1365 = vmatpush.msra.mxu3 %v1849_v26 }
 0x3fe   :  { %1457 = vmatpush.msrb.mxu1 %v1850_v10  ;;  %1499 = vmatpush.msrb.mxu2 %v2259_v6  ;;  %v1858_v6 = vld [vmem:[#allocation11 + $0x40] sm:$0xff] }
 0x3ff   :  { %1366 = vmatpush.msra.mxu3 %v1851_v16 }
 0x400   :  { %1458 = vmatpush.msrb.mxu1 %v1852_v17  ;;  %1500 = vmatpush.msrb.mxu2 %v2263_v5  ;;  %v192_v5 = vpop.permute.xlu0 %191 }
 0x401   :  { %1367 = vmatpush.msra.mxu3 %v1853_v13  ;;  %210 = vst.msk [vmem:[#allocation3 + $0x28] sm:$0xff] %vm164_vm1, %v192_v5 }
 0x402   :  { %1459 = vmatpush.msrb.mxu1 %v1854_v18  ;;  %1501 = vmatpush.msrb.mxu2 %v1855_v19 }
 0x403   :  { %1368 = vmatpush.msra.mxu3 %v1856_v63 }
 0x404   :  { %1688 = vmatmul.msk.f32.vlgmr.msrb.gmra.mxu3 %vm164_vm1, %v1081_v9  ;;  %1460 = vmatpush.msrb.mxu1 %v1857_v35 }
 0x405   :  { %1523 = vmatpush.msrb.mxu3 %v1849_v26  ;;  %1502 = vmatpush.msrb.mxu2 %v1858_v6 }
 0x407   :  { %1524 = vmatpush.msrb.mxu3 %v1851_v16 }
 0x408   :  { %v1128_v14 = vld [vmem:[#allocation3 + $0x28] sm:$0xff] }
 0x409   :  { %1525 = vmatpush.msrb.mxu3 %v1853_v13 }
 0x40b   :  { %1526 = vmatpush.msrb.mxu3 %v1856_v63 }
 0x459   :  { %v258_v5 = vpop.permute.xlu1 %257  ;;  %v194_v36 = vpop.permute.xlu0 %193 }
 0x45a   :  { %275 = vst.msk [vmem:[#allocation5 + $0x30] sm:$0xff] %vm164_vm1, %v258_v5 }
 0x45b   :  { %211 = vst.msk [vmem:[#allocation3 + $0x30] sm:$0xff] %vm164_vm1, %v194_v36 }
 0x461   :  { %v1352_v46 = vld [vmem:[#allocation5 + $0x30] sm:$0xff] }
 0x479   :  { %v1146_v37 = vpop.f32.mrf.mxu1 }
 0x47a   :  { %v1149_v38 = vadd.f32 %v1146_v37, %v1128_v14  ;;  %v161_v14 = vpop.f32.mrf.mxu0 }
 0x47b   :  { %v162_v37 = vadd.f32 %v2294_v45, %v161_v14 }
 0x47c   :  { %v1686_v39 = vmul.f32 -1.442695, %v1149_v38  ;;  %v1286_v38 = vld [vmem:[#allocation3 + $0x30] sm:$0xff] }
 0x47d   :  { %172 = vst.msk [vmem:[#allocation2 + $0x38] sm:$0xff] %vm164_vm1, %v162_v37  ;;  %227 = vrot.lane.b32.xlu2 %v162_v37, %s1995_s13  ;;  %259 = vrot.lane.b32.xlu1 %v162_v37, %s1997_s15 }
 0x47e   :  { %1799 = vpow2.f32 %v1686_v39  ;;  %195 = vrot.lane.b32.xlu0 %v162_v37, %s1996_s14  ;;  %v1241_v39 = vld [vmem:[#allocation2 + $0x30] sm:$0xff] }
 0x47f   :  { %v1104_v41 = vpop.f32.mrf.mxu3 }
 0x480   :  { %v1107_v42 = vadd.f32 %v1104_v41, %v1083_v40  ;;  %v1188_v58 = vpop.f32.mrf.mxu2 }
 0x481   :  { %v1191_v0 = vadd.f32 %v1188_v58, %v1170_v61 }
 0x482   :  { %v1684_v43 = vmul.f32 -1.442695, %v1107_v42 }
 0x484   :  { %v1800_v47 = vpop.eup %1799  ;;  %1801 = vpow2.f32 %v1684_v43  ;;  %v1399_v5 = vld [vmem:[#allocation2 + $0x38] sm:$0xff] }
 0x485   :  { %v1153_v49 = vadd.f32 1.0, %v1800_v47 }
 0x487   :  { %1803 = vrcp.f32 %v1153_v49  ;;  %v1212_v51 = vpop.f32.mrf.mxu3  ;;  %v1165_v21 = vand.u32 2147483648, %v1153_v49  ;;  %vm1159_vm6 = vweird.f32 %v1153_v49  ;;  %v1163_v23 = vand.u32 2147483647, %v1153_v49 }
 0x488   :  { %v1215_v52 = vadd.f32 %v1212_v51, %v1194_v50 }
 0x489   :  { %v1166_v7 = vor.u32 1.1754944e-38, %v1165_v21  ;;  %vm1164_vm10 = vcmp.eq.f32.partialorder %v1163_v23, 8.507059e+37 }
 0x48a   :  { %v1802_v53 = vpop.eup %1801  ;;  %v1689_v54 = vmul.f32 -1.442695, %v1215_v52 }
 0x48b   :  { %v1111_v55 = vadd.f32 1.0, %v1802_v53 }
 0x48c   :  { %1805 = vpow2.f32 %v1689_v54 }
 0x48d   :  { %v1804_v56 = vpop.eup %1803  ;;  %1807 = vrcp.f32 %v1111_v55  ;;  %v1123_v24 = vand.u32 2147483648, %v1111_v55  ;;  %v1121_v3 = vand.u32 2147483647, %v1111_v55  ;;  %vm1117_vm9 = vweird.f32 %v1111_v55 }
 0x48e   :  { %v1155_v31 = vmul.f32 %v1804_v56, %v1153_v49  ;;  %vm1160_vm0 = vweird.f32 %v1804_v56 }
 0x48f   :  { %vm1161_vm7 = vmor %vm1159_vm6, %vm1160_vm0  ;;  %v1124_v11 = vor.u32 1.1754944e-38, %v1123_v24  ;;  %vm1122_vm12 = vcmp.eq.f32.partialorder %v1121_v3, 8.507059e+37 }
 0x490   :  { %v1156_v57 = vsub.f32 1.0, %v1155_v31 }
 0x492   :  { %v1806_v59 = vpop.eup %1805  ;;  %v1157_v60 = vmul.f32 %v1804_v56, %v1156_v57 }
 0x493   :  { %v1808_v62 = vpop.eup %1807  ;;  %v1219_v1 = vadd.f32 1.0, %v1806_v59 }
 0x494   :  { %v1113_v2 = vmul.f32 %v1808_v62, %v1111_v55  ;;  %v1158_v15 = vadd.f32 %v1804_v56, %v1157_v60  ;;  %vm1118_vm8 = vweird.f32 %v1808_v62 }
 0x495   :  { %1809 = vrcp.f32 %v1219_v1  ;;  %vm1119_vm11 = vmor %vm1117_vm9, %vm1118_vm8  ;;  %v1231_v13 = vand.u32 2147483648, %v1219_v1  ;;  %vm1225_vm14 = vweird.f32 %v1219_v1  ;;  %v1229_v18 = vand.u32 2147483647, %v1219_v1 }
 0x496   :  { %v1114_v22 = vsub.f32 1.0, %v1113_v2  ;;  %1811 = vtanh.f32 %v1191_v0  ;;  %v1162_v4 = vsel %vm1161_vm7, %v1804_v56, %v1158_v15 }
 0x497   :  { %v1167_v29 = vsel %vm1164_vm10, %v1166_v7, %v1162_v4  ;;  %v1232_v63 = vor.u32 1.1754944e-38, %v1231_v13  ;;  %vm1230_vm2 = vcmp.eq.f32.partialorder %v1229_v18, 8.507059e+37 }
 0x498   :  { %v1115_v25 = vmul.f32 %v1808_v62, %v1114_v22  ;;  %v1235_v8 = vmul.f32 %v1167_v29, %v2278_v28  ;;  %v226_v28 = vpop.permute.xlu2 %225 }
 0x499   :  { %243 = vst.msk [vmem:[#allocation4 + $0x30] sm:$0xff] %vm164_vm1, %v226_v28 }
 0x49a   :  { %v1116_v48 = vadd.f32 %v1808_v62, %v1115_v25 }
 0x49b   :  { %v1810_v27 = vpop.eup %1809 }
 0x49c   :  { %v1120_v30 = vsel %vm1119_vm11, %v1808_v62, %v1116_v48  ;;  %v1221_v32 = vmul.f32 %v1810_v27, %v1219_v1  ;;  %v1812_v33 = vpop.eup %1811  ;;  %vm1226_vm13 = vweird.f32 %v1810_v27 }
 0x49d   :  { %v1125_v34 = vsel %vm1122_vm12, %v1124_v11, %v1120_v30  ;;  %vm1227_vm15 = vmor %vm1225_vm14, %vm1226_vm13 }
 0x49e   :  { %v1236_v9 = vmul.f32 %v1812_v33, %v1125_v34  ;;  %v1222_v26 = vsub.f32 1.0, %v1221_v32 }
 0x4a0   :  { %v2302_v10 = vadd.f32 %v1236_v9, %v1235_v8  ;;  %v1223_v16 = vmul.f32 %v1810_v27, %v1222_v26  ;;  %v1328_v56 = vld [vmem:[#allocation4 + $0x30] sm:$0xff] }
 0x4a2   :  { %1813 = vtanh.f32 %v2302_v10  ;;  %v1224_v17 = vadd.f32 %v1810_v27, %v1223_v16 }
 0x4a4   :  { %v1228_v19 = vsel %vm1227_vm15, %v1810_v27, %v1224_v17 }
 0x4a5   :  { %v1233_v6 = vsel %vm1230_vm2, %v1232_v63, %v1228_v19 }
 0x4a8   :  { %v1814_v35 = vpop.eup %1813 }
 0x4a9   :  { %v1239_v12 = vmul.f32 %v1814_v35, %v1233_v6 }
 0x4ab   :  { %1690 = vmatmul.msk.f32.vlgmr.msrb.gmra.mxu0 %vm164_vm1, %v1239_v12  ;;  %1692 = vmatmul.msk.f32.vlgmr.msra.gmra.mxu1 %vm164_vm1, %v1239_v12 }
 0x4ac   :  { %1694 = vmatmul.msk.f32.vlgmr.msra.gmra.mxu2 %vm164_vm1, %v1239_v12  ;;  %1695 = vmatmul.msk.f32.vlgmr.msra.gmra.mxu3 %vm164_vm1, %v1239_v12 }
 0x4ef   :  { %v260_v12 = vpop.permute.xlu1 %259 }
 0x4f0   :  { %276 = vst.msk [vmem:[#allocation5 + $0x38] sm:$0xff] %vm164_vm1, %v260_v12  ;;  %v196_v28 = vpop.permute.xlu0 %195 }
 0x4f1   :  { %212 = vst.msk [vmem:[#allocation3 + $0x38] sm:$0xff] %vm164_vm1, %v196_v28  ;;  %v1609_v28 = vlaneseq }
 0x4f8   :  { %v1444_v14 = vld [vmem:[#allocation3 + $0x38] sm:$0xff] }
 0x528   :  { %v1262_v40 = vpop.f32.mrf.mxu0  ;;  %v1304_v41 = vpop.f32.mrf.mxu1 }
 0x529   :  { %v1265_v42 = vadd.f32 %v1262_v40, %v1241_v39  ;;  %v1307_v43 = vadd.f32 %v1304_v41, %v1286_v38 }
 0x52b   :  { %v1691_v20 = vmul.f32 -1.442695, %v1265_v42  ;;  %v1693_v44 = vmul.f32 -1.442695, %v1307_v43  ;;  %v1559_v42 = vld [vmem:[#allocation12 + $0x18] sm:$0xff]  ;;  %v1558_v43 = vld [vmem:[#allocation12 + $0x10] sm:$0xff] }
 0x52c   :  { %1575 = vmatpush.msrb.mxu0 %v1559_v42 }
 0x52d   :  { %1815 = vpow2.f32 %v1691_v20  ;;  %v1557_v20 = vld [vmem:[#allocation12 + $0x8] sm:$0xff] }
 0x52e   :  { %1817 = vpow2.f32 %v1693_v44  ;;  %v1510_v44 = vld [vmem:[#allocation5 + $0x38] sm:$0xff]  ;;  %1576 = vmatpush.msrb.mxu0 %v1558_v43 }
 0x52f   :  { %v1370_v45 = vpop.f32.mrf.mxu3  ;;  %v1346_v54 = vpop.f32.mrf.mxu2 }
 0x530   :  { %v1373_v47 = vadd.f32 %v1370_v45, %v1352_v46  ;;  %v1349_v58 = vadd.f32 %v1346_v54, %v1328_v56  ;;  %1577 = vmatpush.msrb.mxu0 %v1557_v20 }
 0x532   :  { %v1696_v49 = vmul.f32 -1.442695, %v1373_v47  ;;  %v1556_v47 = vld [vmem:[#allocation12] sm:$0xff] }
 0x533   :  { %v1816_v50 = vpop.eup %1815  ;;  %1578 = vmatpush.msrb.mxu0 %v1556_v47 }
 0x534   :  { %v1818_v51 = vpop.eup %1817  ;;  %v1269_v52 = vadd.f32 1.0, %v1816_v50  ;;  %1819 = vpow2.f32 %v1696_v49 }
 0x535   :  { %v1311_v53 = vadd.f32 1.0, %v1818_v51 }
 0x536   :  { %1821 = vrcp.f32 %v1269_v52  ;;  %v1281_v1 = vand.u32 2147483648, %v1269_v52  ;;  %v1279_v21 = vand.u32 2147483647, %v1269_v52  ;;  %vm1275_vm5 = vweird.f32 %v1269_v52 }
 0x537   :  { %1823 = vrcp.f32 %v1311_v53  ;;  %v1323_v2 = vand.u32 2147483648, %v1311_v53  ;;  %v1321_v23 = vand.u32 2147483647, %v1311_v53  ;;  %vm1317_vm0 = vweird.f32 %v1311_v53 }
 0x538   :  { %v1282_v3 = vor.u32 1.1754944e-38, %v1281_v1  ;;  %vm1280_vm8 = vcmp.eq.f32.partialorder %v1279_v21, 8.507059e+37 }
 0x539   :  { %v1324_v48 = vor.u32 1.1754944e-38, %v1323_v2  ;;  %vm1322_vm9 = vcmp.eq.f32.partialorder %v1321_v23, 8.507059e+37 }
 0x53a   :  { %v1820_v55 = vpop.eup %1819 }
 0x53b   :  { %v1377_v31 = vadd.f32 1.0, %v1820_v55 }
 0x53c   :  { %v1822_v57 = vpop.eup %1821 }
 0x53d   :  { %v1824_v59 = vpop.eup %1823  ;;  %v1271_v60 = vmul.f32 %v1822_v57, %v1269_v52  ;;  %1825 = vrcp.f32 %v1377_v31  ;;  %vm1276_vm3 = vweird.f32 %v1822_v57  ;;  %v1389_v17 = vand.u32 2147483648, %v1377_v31 }
 0x53e   :  { %v1313_v61 = vmul.f32 %v1824_v59, %v1311_v53  ;;  %1827 = vtanh.f32 %v1349_v58  ;;  %vm1318_vm4 = vweird.f32 %v1824_v59  ;;  %vm1277_vm6 = vmor %vm1275_vm5, %vm1276_vm3  ;;  %vm1383_vm11 = vweird.f32 %v1377_v31 }
 0x53f   :  { %v1272_v62 = vsub.f32 1.0, %v1271_v60  ;;  %vm1319_vm7 = vmor %vm1317_vm0, %vm1318_vm4  ;;  %v1387_v13 = vand.u32 2147483647, %v1377_v31  ;;  %v1390_v19 = vor.u32 1.1754944e-38, %v1389_v17 }
 0x540   :  { %v1314_v0 = vsub.f32 1.0, %v1313_v61 }
 0x541   :  { %v1273_v15 = vmul.f32 %v1822_v57, %v1272_v62  ;;  %vm1388_vm13 = vcmp.eq.f32.partialorder %v1387_v13, 8.507059e+37 }
 0x542   :  { %v1315_v22 = vmul.f32 %v1824_v59, %v1314_v0 }
 0x543   :  { %v1826_v24 = vpop.eup %1825  ;;  %v1274_v25 = vadd.f32 %v1822_v57, %v1273_v15 }
 0x544   :  { %v1316_v4 = vadd.f32 %v1824_v59, %v1315_v22  ;;  %v1379_v7 = vmul.f32 %v1826_v24, %v1377_v31  ;;  %v1828_v11 = vpop.eup %1827  ;;  %vm1384_vm10 = vweird.f32 %v1826_v24 }
 0x545   :  { %v1278_v27 = vsel %vm1277_vm6, %v1822_v57, %v1274_v25  ;;  %vm1385_vm12 = vmor %vm1383_vm11, %vm1384_vm10 }
 0x546   :  { %v1283_v29 = vsel %vm1280_vm8, %v1282_v3, %v1278_v27  ;;  %v1320_v30 = vsel %vm1319_vm7, %v1824_v59, %v1316_v4  ;;  %v1380_v32 = vsub.f32 1.0, %v1379_v7 }
 0x547   :  { %v1325_v33 = vsel %vm1322_vm9, %v1324_v48, %v1320_v30  ;;  %v1394_v34 = vmul.f32 %v1828_v11, %v1283_v29 }
 0x548   :  { %v1393_v8 = vmul.f32 %v1325_v33, %v2302_v10  ;;  %v1381_v9 = vmul.f32 %v1826_v24, %v1380_v32  ;;  %v228_v10 = vpop.permute.xlu2 %227 }
 0x549   :  { %244 = vst.msk [vmem:[#allocation4 + $0x38] sm:$0xff] %vm164_vm1, %v228_v10 }
 0x54a   :  { %v2318_v26 = vadd.f32 %v1394_v34, %v1393_v8  ;;  %v1382_v16 = vadd.f32 %v1826_v24, %v1381_v9 }
 0x54c   :  { %1829 = vtanh.f32 %v2318_v26  ;;  %v1386_v18 = vsel %vm1385_vm12, %v1826_v24, %v1382_v16  ;;  %vm1615_vm12 = vcmask 9216  }
 0x54d   :  { %v1391_v35 = vsel %vm1388_vm13, %v1390_v19, %v1386_v18 }
 0x550   :  { %v1486_v56 = vld [vmem:[#allocation4 + $0x38] sm:$0xff] }
 0x552   :  { %v1830_v63 = vpop.eup %1829 }
 0x553   :  { %v1397_v6 = vmul.f32 %v1830_v63, %v1391_v35 }
 0x555   :  { %1697 = vmatmul.msk.f32.vlgmr.msra.gmra.mxu0 %vm164_vm1, %v1397_v6  ;;  %1699 = vmatmul.msk.f32.vlgmr.msrb.gmra.mxu1 %vm164_vm1, %v1397_v6 }
 0x556   :  { %1701 = vmatmul.msk.f32.vlgmr.msrb.gmra.mxu2 %vm164_vm1, %v1397_v6  ;;  %1702 = vmatmul.msk.f32.vlgmr.msrb.gmra.mxu3 %vm164_vm1, %v1397_v6 }
 0x5d2   :  { %v1420_v36 = vpop.f32.mrf.mxu0  ;;  %v1462_v37 = vpop.f32.mrf.mxu1 }
 0x5d3   :  { %v1423_v38 = vadd.f32 %v1420_v36, %v1399_v5  ;;  %v1465_v39 = vadd.f32 %v1462_v37, %v1444_v14  ;;  %v1610_v5 = vshrl.u32 %v1609_v28, 7  ;;  %v1612_v36 = vand.u32 127, %v1609_v28 }
 0x5d5   :  { %v1698_v40 = vmul.f32 -1.442695, %v1423_v38  ;;  %v1700_v41 = vmul.f32 -1.442695, %v1465_v39  ;;  %vm1613_vm11 = vcmp.eq.s32.totalorder %v1610_v5, %v1612_v36 }
 0x5d7   :  { %1831 = vpow2.f32 %v1698_v40 }
 0x5d8   :  { %1833 = vpow2.f32 %v1700_v41 }
 0x5d9   :  { %v1528_v46 = vpop.f32.mrf.mxu3  ;;  %v1504_v54 = vpop.f32.mrf.mxu2 }
 0x5da   :  { %v1531_v45 = vadd.f32 %v1528_v46, %v1510_v44  ;;  %v1507_v58 = vadd.f32 %v1504_v54, %v1486_v56 }
 0x5dc   :  { %v1703_v49 = vmul.f32 -1.442695, %v1531_v45 }
 0x5dd   :  { %v1832_v50 = vpop.eup %1831 }
 0x5de   :  { %v1834_v51 = vpop.eup %1833  ;;  %v1427_v52 = vadd.f32 1.0, %v1832_v50  ;;  %1835 = vpow2.f32 %v1703_v49 }
 0x5df   :  { %v1469_v53 = vadd.f32 1.0, %v1834_v51 }
 0x5e0   :  { %1837 = vrcp.f32 %v1427_v52  ;;  %v1439_v1 = vand.u32 2147483648, %v1427_v52  ;;  %v1437_v21 = vand.u32 2147483647, %v1427_v52  ;;  %vm1433_vm2 = vweird.f32 %v1427_v52 }
 0x5e1   :  { %1839 = vrcp.f32 %v1469_v53  ;;  %v1481_v2 = vand.u32 2147483648, %v1469_v53  ;;  %v1479_v23 = vand.u32 2147483647, %v1469_v53  ;;  %vm1475_vm3 = vweird.f32 %v1469_v53 }
 0x5e2   :  { %v1440_v3 = vor.u32 1.1754944e-38, %v1439_v1  ;;  %vm1438_vm0 = vcmp.eq.f32.partialorder %v1437_v21, 8.507059e+37 }
 0x5e3   :  { %v1482_v48 = vor.u32 1.1754944e-38, %v1481_v2  ;;  %vm1480_vm6 = vcmp.eq.f32.partialorder %v1479_v23, 8.507059e+37 }
 0x5e4   :  { %v1836_v55 = vpop.eup %1835 }
 0x5e5   :  { %v1535_v31 = vadd.f32 1.0, %v1836_v55 }
 0x5e6   :  { %v1838_v57 = vpop.eup %1837 }
 0x5e7   :  { %v1840_v59 = vpop.eup %1839  ;;  %v1429_v60 = vmul.f32 %v1838_v57, %v1427_v52  ;;  %1841 = vrcp.f32 %v1535_v31  ;;  %vm1434_vm14 = vweird.f32 %v1838_v57  ;;  %v1547_v13 = vand.u32 2147483648, %v1535_v31 }
 0x5e8   :  { %v1471_v61 = vmul.f32 %v1840_v59, %v1469_v53  ;;  %1843 = vtanh.f32 %v1507_v58  ;;  %vm1476_vm15 = vweird.f32 %v1840_v59  ;;  %vm1435_vm4 = vmor %vm1433_vm2, %vm1434_vm14  ;;  %vm1541_vm8 = vweird.f32 %v1535_v31 }
 0x5e9   :  { %v1430_v62 = vsub.f32 1.0, %v1429_v60  ;;  %vm1477_vm5 = vmor %vm1475_vm3, %vm1476_vm15  ;;  %v1545_v18 = vand.u32 2147483647, %v1535_v31  ;;  %v1548_v63 = vor.u32 1.1754944e-38, %v1547_v13 }
 0x5ea   :  { %v1472_v0 = vsub.f32 1.0, %v1471_v61 }
 0x5eb   :  { %v1431_v15 = vmul.f32 %v1838_v57, %v1430_v62  ;;  %vm1546_vm10 = vcmp.eq.f32.partialorder %v1545_v18, 8.507059e+37 }
 0x5ec   :  { %v1473_v22 = vmul.f32 %v1840_v59, %v1472_v0 }
 0x5ed   :  { %v1842_v24 = vpop.eup %1841  ;;  %v1432_v25 = vadd.f32 %v1838_v57, %v1431_v15 }
 0x5ee   :  { %v1474_v4 = vadd.f32 %v1840_v59, %v1473_v22  ;;  %v1537_v7 = vmul.f32 %v1842_v24, %v1535_v31  ;;  %v1844_v11 = vpop.eup %1843  ;;  %vm1542_vm7 = vweird.f32 %v1842_v24 }
 0x5ef   :  { %v1436_v27 = vsel %vm1435_vm4, %v1838_v57, %v1432_v25  ;;  %vm1543_vm9 = vmor %vm1541_vm8, %vm1542_vm7 }
 0x5f0   :  { %v1441_v29 = vsel %vm1438_vm0, %v1440_v3, %v1436_v27  ;;  %v1478_v30 = vsel %vm1477_vm5, %v1840_v59, %v1474_v4  ;;  %v1538_v32 = vsub.f32 1.0, %v1537_v7 }
 0x5f1   :  { %v1483_v33 = vsel %vm1480_vm6, %v1482_v48, %v1478_v30  ;;  %v1552_v34 = vmul.f32 %v1844_v11, %v1441_v29 }
 0x5f2   :  { %v1551_v8 = vmul.f32 %v1483_v33, %v2318_v26  ;;  %v1539_v9 = vmul.f32 %v1842_v24, %v1538_v32 }
 0x5f4   :  { %v1553_v16 = vadd.f32 %v1552_v34, %v1551_v8  ;;  %v1540_v17 = vadd.f32 %v1842_v24, %v1539_v9 }
 0x5f6   :  { %1845 = vtanh.f32 %v1553_v16  ;;  %v1544_v19 = vsel %vm1543_vm9, %v1842_v24, %v1540_v17 }
 0x5f7   :  { %v1549_v6 = vsel %vm1546_vm10, %v1548_v63, %v1544_v19 }
 0x5fc   :  { %v1846_v35 = vpop.eup %1845 }
 0x5fd   :  { %v1555_v10 = vmul.f32 %v1846_v35, %v1549_v6 }
 0x5ff   :  { %1704 = vmatmul.msk.f32.vlgmr.msrb.gmra.mxu0 %vm164_vm1, %v1555_v10  ;;  %v1583_v12 = vrot.slane %v1555_v10, 2 }
 0x601   :  { %1705 = vmatpush.xpose.msk.msra.mxu1 %vm164_vm1, %v1583_v12 }
 0x67c   :  { %v1580_v26 = vpop.f32.mrf.mxu0 }
 0x67d   :  { %1706 = vmatmul.msk.f32.vlgmr.msra.gmra.mxu1 %vm164_vm1, %v1580_v26  ;;  %vm1623_vm1 = vcmask 8192  }
 0x6fa   :  { %v1606_v14 = vpop.f32.mrf.mxu1 }
 0x6fb   :  { %v1614_v37 = vsel %vm1613_vm11, %v1606_v14, 0.0 }
 0x6fc   :  { %v1616_v38 = vsel %vm1615_vm12, %v1614_v37, 0.0 }
 0x6fd   :  { %v1617_v39 = vrot.slane %v1616_v38, 4 }
 0x6ff   :  { %v1618_v40 = vadd.f32 %v1617_v39, %v1616_v38 }
 0x701   :  { %v1619_v41 = vrot.slane %v1618_v40, 2 }
 0x703   :  { %v1620_v42 = vadd.f32 %v1619_v41, %v1618_v40 }
 0x705   :  { %v1621_v43 = vrot.slane %v1620_v42, 1 }
 0x707   :  { %v1622_v20 = vadd.f32 %v1621_v43, %v1620_v42 }
 0x709   :  { %1624 = vst.msk [vmem:[#allocation14] sm:$0x1] %vm1623_vm1, %v1622_v20 }
 0x70a   :  { %1635 = dma.vmem_to_hbm [thread:$0]  %s1631_s18, 16, %s1633_s21, [#allocation8]  }
 0x70b   :  { %1986 = dma.done.wait [#allocation8], 16  }
 0x70c   :  { %1987 = vsyncadd [#allocation8], 4294967280 }
 0x70d   :  { %1640 = vsyncpa [#allocation7], 1 }
 0x70e   :  { %1641 = vsyncpa [#allocation10], 1 }
 0x70f   :  { %1642 = vsyncpa [#allocation13], 1 }
 0x710   :  { %1643 = vsyncpa [#allocation8], 1 }

</bundles_post_ra>
